<compile_context>
chip_gen: v5e
topology: v5e:2x2
jax: 0.10.0
libtpu: 0.0.40
codegen_flags: <defaults>
</compile_context>

<pallas_src>
import functools
import math

import jax
import jax.numpy as jnp
import numpy as np
from jax.experimental import pallas as pl
from jax.experimental.pallas import tpu as pltpu

NEG_SLOPE_ATTN = 0.2   # leaky_relu slope on attention logits (GAT-style)
NEG_SLOPE_ACT = 0.01   # default torch leaky_relu slope on the output activation


def _leaky(v, slope):
    return jnp.where(v > 0, v, slope * v)


def _round_up(v, m):
    return ((v + m - 1) // m) * m


def _pad_rows(a, rows):
    pad = rows - a.shape[0]
    if pad == 0:
        return a
    return jnp.concatenate([a, jnp.zeros((pad,) + a.shape[1:], a.dtype)], axis=0)


@functools.lru_cache(maxsize=None)
def _vmem_limit_bytes():
    cap = 64 * 1024 * 1024
    try:
        cap = int(getattr(pltpu.get_tpu_info(), "vmem_capacity_bytes", cap))
    except Exception:
        pass
    # ~3/4 of physical: ~96 MiB on 128 MiB v5e/v6e, ~48 MiB on 64 MiB v7x.
    return max(32 * 1024 * 1024, min(cap * 3 // 4, 100 * 1024 * 1024))


# --------------------------------------------------------------------------
# Per-edge score kernels (edge-tiled, 'parallel' grid axis, bf16 streams)
# --------------------------------------------------------------------------
def _transh_score_kernel(hs_ref, hd_ref, ew_ref, eb_ref, s_ref):
    hs = hs_ref[...].astype(jnp.float32)                      # [TE, D]
    hd = hd_ref[...].astype(jnp.float32)
    ew = ew_ref[...].astype(jnp.float32)
    eb = eb_ref[...].astype(jnp.float32)
    proj_s = hs - jnp.sum(ew * hs, axis=-1, keepdims=True) * ew
    proj_d = hd - jnp.sum(ew * hd, axis=-1, keepdims=True) * ew
    diff = proj_s + eb - proj_d
    score = -jnp.sum(diff * diff, axis=-1, keepdims=True)     # [TE, 1]
    s_ref[...] = _leaky(score, NEG_SLOPE_ATTN)


def transh_edge_scores(h_src, h_dst, e_w, e_b, *, edge_tile):
    e_pad, d = h_src.shape
    steps = e_pad // edge_tile
    spec = pl.BlockSpec((edge_tile, d), lambda j: (j, 0))
    return pl.pallas_call(
        _transh_score_kernel,
        grid=(steps,),
        in_specs=[spec, spec, spec, spec],
        out_specs=pl.BlockSpec((edge_tile, 1), lambda j: (j, 0)),
        out_shape=jax.ShapeDtypeStruct((e_pad, 1), jnp.float32),
        compiler_params=pltpu.CompilerParams(
            dimension_semantics=("parallel",),
            vmem_limit_bytes=_vmem_limit_bytes()),
    )(h_src, h_dst, e_w, e_b)


def _cond_score_kernel(hs_ref, tgt_ref, s_ref, *, inv_sqrt_d):
    s = jnp.sum(hs_ref[...].astype(jnp.float32) * tgt_ref[...].astype(jnp.float32),
                axis=-1, keepdims=True) * inv_sqrt_d
    s_ref[...] = _leaky(s, NEG_SLOPE_ATTN)


def cond_edge_scores(h_src, tgt, *, edge_tile):
    e_pad, d = h_src.shape
    steps = e_pad // edge_tile
    spec = pl.BlockSpec((edge_tile, d), lambda j: (j, 0))
    kernel = functools.partial(_cond_score_kernel, inv_sqrt_d=1.0 / math.sqrt(d))
    return pl.pallas_call(
        kernel,
        grid=(steps,),
        in_specs=[spec, spec],
        out_specs=pl.BlockSpec((edge_tile, 1), lambda j: (j, 0)),
        out_shape=jax.ShapeDtypeStruct((e_pad, 1), jnp.float32),
        compiler_params=pltpu.CompilerParams(
            dimension_semantics=("parallel",),
            vmem_limit_bytes=_vmem_limit_bytes()),
    )(h_src, tgt)


# --------------------------------------------------------------------------
# Node-tiled scatter aggregation + dense + residual + leaky_relu
# (sorted edges, CSR-style per-node-tile edge windows via scalar prefetch)
# --------------------------------------------------------------------------
def _aggregate_kernel(fb_ref, nb_ref, dst_ref, alpha_ref, hsrc_ref, x_ref, w_ref, b_ref,
                      out_ref, acc_ref, *, node_tile, edge_tile, residual):
    i = pl.program_id(0)      # node tile
    j = pl.program_id(1)      # edge-block step inside this node tile's window

    @pl.when(j == 0)
    def _():
        acc_ref[...] = jnp.zeros_like(acc_ref)

    @pl.when(j < nb_ref[i])
    def _():
        dst_col = dst_ref[...]                                    # [TE, 1] int32 (sorted)
        alpha_col = alpha_ref[...]                                # [TE, 1] f32 (normalized)
        node_ids = i * node_tile + jax.lax.broadcasted_iota(
            jnp.int32, (edge_tile, node_tile), 1)                 # [TE, TN]
        # alpha folded directly into the on-the-fly (transposed) scatter mask; f32 math,
        # bf16 only at the MXU input.
        scat_t = jnp.where(dst_col == node_ids, alpha_col, 0.0).astype(jnp.bfloat16)
        # acc[TN, D] += scat_t^T @ h_src : contract the edge (sublane) axis on the MXU.
        acc_ref[...] += jax.lax.dot_general(
            scat_t, hsrc_ref[...], (((0,), (0,)), ((), ())),
            preferred_element_type=jnp.float32)

    @pl.when(j == pl.num_programs(1) - 1)
    def _():
        out = jnp.dot(acc_ref[...], w_ref[...],
                      preferred_element_type=jnp.float32) + b_ref[...]
        if residual:
            out = out + x_ref[...]
        out_ref[...] = _leaky(out, NEG_SLOPE_ACT)


def attention_aggregate(first_blk, n_blk, dst_col, alpha_col, h_src, x, w, b, *,
                        node_tile, edge_tile, max_blocks, residual):
    n_pad, d = x.shape
    e_pad = h_src.shape[0]
    num_e_blocks = e_pad // edge_tile
    n_tiles = n_pad // node_tile

    def edge_map(i, j, fb_ref, nb_ref):
        # Clamp past-the-window steps onto the last valid block so no extra DMA is issued
        # (same index -> block reuse); pl.when skips their compute.
        jj = jnp.minimum(j, jnp.maximum(nb_ref[i] - 1, 0))
        return (jnp.minimum(fb_ref[i] + jj, num_e_blocks - 1), 0)

    kernel = functools.partial(_aggregate_kernel, node_tile=node_tile,
                               edge_tile=edge_tile, residual=residual)
    return pl.pallas_call(
        kernel,
        grid_spec=pltpu.PrefetchScalarGridSpec(
            num_scalar_prefetch=2,
            grid=(n_tiles, max_blocks),
            in_specs=[
                pl.BlockSpec((edge_tile, 1), edge_map),                     # dst (sorted)
                pl.BlockSpec((edge_tile, 1), edge_map),                     # alpha (f32)
                pl.BlockSpec((edge_tile, d), edge_map),                     # h_src (bf16)
                pl.BlockSpec((node_tile, d), lambda i, j, fb, nb: (i, 0)),  # x (residual)
                pl.BlockSpec((d, d), lambda i, j, fb, nb: (0, 0)),          # W
                pl.BlockSpec((1, d), lambda i, j, fb, nb: (0, 0)),          # b
            ],
            out_specs=pl.BlockSpec((node_tile, d), lambda i, j, fb, nb: (i, 0)),
            scratch_shapes=[pltpu.VMEM((node_tile, d), jnp.float32)],
        ),
        out_shape=jax.ShapeDtypeStruct((n_pad, d), jnp.float32),
        compiler_params=pltpu.CompilerParams(
            dimension_semantics=("parallel", "arbitrary"),
            vmem_limit_bytes=_vmem_limit_bytes()),
    )(first_blk, n_blk, dst_col, alpha_col, h_src, x, w, b)


# --------------------------------------------------------------------------
# Encoder wrapper (mirrors KCANEncoder.forward)
# --------------------------------------------------------------------------
class KCANEncoderPallas:
    def __init__(self, hidden_dim, out_dim, edge_score_type, residual, k_hops, c_hops,
                 key, node_tile=256, edge_tile_agg=512, edge_tile_score=2048):
        assert edge_score_type in ['dnn', 'transH', 'gat']
        if edge_score_type != 'transH':
            # TODO(synk): 'dnn' edge scorer and GATConv ('gat') paths are not implemented.
            raise NotImplementedError("only edge_score_type='transH' is implemented")
        assert node_tile % 8 == 0
        assert edge_tile_agg % 128 == 0 and edge_tile_score % 128 == 0
        self.hidden_dim = hidden_dim
        self.out_dim = out_dim          # unused in the reference forward as well
        self.residual = residual
        self.k_hops = k_hops
        self.c_hops = c_hops
        self.node_tile = node_tile
        self.edge_tile_agg = edge_tile_agg
        self.edge_tile_score = edge_tile_score

        d = hidden_dim
        scale = 1.0 / math.sqrt(d)
        keys = jax.random.split(key, max(k_hops + c_hops, 1) + 1)
        self.k_params = []
        for i in range(k_hops):
            w = jax.random.uniform(keys[i], (d, d), jnp.float32, -scale, scale)
            self.k_params.append((w, jnp.zeros((1, d), jnp.float32)))
        self.c_params = []
        for i in range(c_hops):
            w = jax.random.uniform(keys[k_hops + i], (d, d), jnp.float32, -scale, scale)
            self.c_params.append((w, jnp.zeros((1, d), jnp.float32)))

    def forward(self, x, e_w, e_b, edge_index, root_index, e_num_per_sample):
        n, d = x.shape
        e = int(edge_index.shape[1])

        # ---- tile sizes / padding ----
        n_pad = _round_up(max(n, 8), 8)
        tn = min(self.node_tile, n_pad)
        n_pad = _round_up(n_pad, tn)
        n_tiles = n_pad // tn

        te_a = min(self.edge_tile_agg, _round_up(e, 128))
        te_s = max(te_a, (min(self.edge_tile_score, _round_up(e, te_a)) // te_a) * te_a)
        e_pad = _round_up(e, te_s)                 # multiple of both te_s and te_a
        pad_e = e_pad - e
        num_agg_blocks = e_pad // te_a

        # ---- host-side graph preprocessing: sort edges by dst, CSR-style windows ----
        src_np = np.asarray(edge_index[0]).astype(np.int32)
        dst_np = np.asarray(edge_index[1]).astype(np.int32)
        order = np.argsort(dst_np, kind="stable")
        dst_sorted = dst_np[order]
        src_sorted = src_np[order]
        e_counts = np.asarray(e_num_per_sample).astype(np.int64)
        sample_id = np.repeat(np.arange(e_counts.shape[0], dtype=np.int32), e_counts)
        sample_id = sample_id[order]

        dst_sp = np.concatenate([dst_sorted, np.full((pad_e,), n_pad, np.int32)])
        src_sp = np.concatenate([src_sorted, np.zeros((pad_e,), np.int32)])
        sid_sp = np.concatenate([sample_id, np.zeros((pad_e,), np.int32)])

        tile_lo = np.arange(n_tiles, dtype=np.int64) * tn
        starts = np.searchsorted(dst_sorted, tile_lo, side="left")
        ends = np.searchsorted(dst_sorted, tile_lo + tn, side="left")
        has = ends > starts
        fb_np = np.where(has, starts // te_a, 0).astype(np.int32)
        lb_np = np.where(has, np.maximum(ends - 1, 0) // te_a, 0).astype(np.int32)
        nb_np = np.where(has, lb_np - fb_np + 1, 0).astype(np.int32)
        max_blocks = int(max(int(nb_np.max()), 1))

        first_blk = jnp.asarray(fb_np)
        n_blk = jnp.asarray(nb_np)
        dst_dev = jnp.asarray(dst_sp)                       # [E_pad] int32, sorted/padded
        src_dev = jnp.asarray(src_sp)
        dst_gather = jnp.minimum(dst_dev, n_pad - 1)        # clamp the dummy segment id
        dst_col = dst_dev[:, None]                          # [E_pad, 1]
        seg = dst_dev                                       # segment ids (dummy = n_pad)
        valid = jnp.asarray((np.arange(e_pad) < e).astype(np.float32))

        e_w_s = _pad_rows(jnp.asarray(e_w, jnp.float32)[order], e_pad).astype(jnp.bfloat16)
        e_b_s = _pad_rows(jnp.asarray(e_b, jnp.float32)[order], e_pad).astype(jnp.bfloat16)
        x_p = jnp.zeros((n_pad, d), jnp.float32).at[:n].set(jnp.asarray(x, jnp.float32))

        def segment_alpha(scores, pre_alpha=None):
            # Exact f32 segment softmax (max shift + denominator) as cheap O(E) XLA glue.
            m = jax.ops.segment_max(scores, seg, num_segments=n_pad + 1)
            es = jnp.exp(scores - m[seg]) * valid
            if pre_alpha is not None:
                es = es * pre_alpha
            denom = jax.ops.segment_sum(es, seg, num_segments=n_pad + 1)
            return es / jnp.maximum(denom[seg], 1e-9)

        def aggregate(alpha, h_src_bf16, xin, w, b):
            return attention_aggregate(
                first_blk, n_blk, dst_col, alpha[:, None], h_src_bf16, xin, w, b,
                node_tile=tn, edge_tile=te_a, max_blocks=max_blocks,
                residual=self.residual)

        # ---- knowledge hops (transH edge scores) ----
        alpha_k = None
        for w, b in self.k_params:
            h_src = x_p[src_dev].astype(jnp.bfloat16)       # single gather+cast per hop,
            h_dst = x_p[dst_gather].astype(jnp.bfloat16)    # shared by score + aggregate
            score = transh_edge_scores(h_src, h_dst, e_w_s, e_b_s, edge_tile=te_s)[:, 0]
            alpha_k = segment_alpha(score)
            x_p = aggregate(alpha_k, h_src, x_p, w, b)

        # ---- target embeddings expanded to (sorted) edges ----
        roots = jnp.asarray(root_index).reshape(-1, 2)
        tgt_samples = x_p[roots].mean(axis=1)                          # [B, D]
        tgt_edges = tgt_samples[jnp.asarray(sid_sp)].astype(jnp.bfloat16)   # [E_pad, D]

        # ---- condition hops (target-conditioned attention, modulated by pre_alpha) ----
        for w, b in self.c_params:
            h_src = x_p[src_dev].astype(jnp.bfloat16)
            score = cond_edge_scores(h_src, tgt_edges, edge_tile=te_s)[:, 0]
            alpha_c = segment_alpha(score, pre_alpha=alpha_k)
            x_p = aggregate(alpha_c, h_src, x_p, w, b)

        return x_p[roots]                                   # [B, 2, D]


# --------------------------------------------------------------------------
# Pure-JAX reference (original per-edge softmax formulation) for self-check
# --------------------------------------------------------------------------
def reference_forward(k_params, c_params, residual, x, e_w, e_b,
                      edge_index, root_index, e_num_per_sample):
    n, d = x.shape
    e = edge_index.shape[1]
    src, dst = edge_index[0], edge_index[1]

    def seg_softmax_aggregate(score, pre_alpha, h_src):
        m = jax.ops.segment_max(score, dst, num_segments=n)
        es = jnp.exp(score - m[dst])
        if pre_alpha is not None:
            es = es * pre_alpha
        denom = jax.ops.segment_sum(es, dst, num_segments=n)
        alpha = es / jnp.maximum(denom[dst], 1e-9)
        msg = jax.ops.segment_sum(alpha[:, None] * h_src, dst, num_segments=n)
        return alpha, msg

    alpha = None
    for w, b in k_params:
        hs = x[src]
        hd = x[dst]
        ps = hs - jnp.sum(e_w * hs, -1, keepdims=True) * e_w
        pd = hd - jnp.sum(e_w * hd, -1, keepdims=True) * e_w
        diff = ps + e_b - pd
        s = _leaky(-jnp.sum(diff * diff, -1), NEG_SLOPE_ATTN)
        alpha, msg = seg_softmax_aggregate(s, None, hs)
        out = msg @ w + b
        if residual:
            out = out + x
        x = _leaky(out, NEG_SLOPE_ACT)

    roots = root_index.reshape(-1, 2)
    tgt = jnp.repeat(x[roots], e_num_per_sample, axis=0,
                     total_repeat_length=e).mean(axis=1)
    for w, b in c_params:
        hs = x[src]
        s = _leaky(jnp.sum(hs * tgt, -1) / math.sqrt(d), NEG_SLOPE_ATTN)
        _, msg = seg_softmax_aggregate(s, alpha, hs)
        out = msg @ w + b
        if residual:
            out = out + x
        x = _leaky(out, NEG_SLOPE_ACT)
    return x[roots]


if __name__ == "__main__":
    key = jax.random.PRNGKey(0)
    N, E, D, B = 32, 260, 32, 2
    keys = jax.random.split(key, 8)

    x = jax.random.normal(keys[0], (N, D), jnp.float32)
    e_w = jax.random.normal(keys[1], (E, D), jnp.float32)
    e_w = e_w / jnp.linalg.norm(e_w, axis=-1, keepdims=True)      # unit hyperplane normals
    e_b = 0.1 * jax.random.normal(keys[2], (E, D), jnp.float32)

    # sample 0 owns nodes [0,16) / first 130 edges; sample 1 owns nodes [16,32) / last 130
    e0 = E // 2
    src0 = jax.random.randint(keys[3], (e0,), 0, N // 2)
    dst0 = jax.random.randint(keys[4], (e0,), 0, N // 2)
    src1 = jax.random.randint(keys[5], (E - e0,), N // 2, N)
    dst1 = jax.random.randint(keys[6], (E - e0,), N // 2, N)
    edge_index = jnp.stack([jnp.concatenate([src0, src1]),
                            jnp.concatenate([dst0, dst1])]).astype(jnp.int32)
    root_index = jnp.array([0, 1, 16, 17], jnp.int32)             # 2 roots per sample
    e_num_per_sample = jnp.array([e0, E - e0], jnp.int32)

    # Small tiles chosen to exercise multi-node-tile / multi-edge-block windows + clamping.
    enc = KCANEncoderPallas(hidden_dim=D, out_dim=D, edge_score_type='transH',
                            residual=True, k_hops=1, c_hops=1, key=keys[7],
                            node_tile=16, edge_tile_agg=128, edge_tile_score=256)
    out = enc.forward(x, e_w, e_b, edge_index, root_index, e_num_per_sample)
    out = jax.block_until_ready(out)
    assert out.shape == (B, 2, D) and out.dtype == jnp.float32
    assert bool(jnp.all(jnp.isfinite(out)))

    ref = reference_forward(enc.k_params, enc.c_params, enc.residual, x, e_w, e_b,
                            edge_index, root_index, e_num_per_sample)
    max_err = float(jnp.max(jnp.abs(out - ref)))
    assert max_err < 1e-1, f"mismatch vs pure-JAX reference: max_err={max_err}"
    print("KERNEL_OK")
</pallas_src>

<mosaic_0001>
module attributes {stable_mosaic.version = 11 : i64} {
  func.func @_transh_score_kernel(%arg0: i32, %arg1: memref<256x32xbf16, #tpu.memory_space<vmem>>, %arg2: memref<256x32xbf16, #tpu.memory_space<vmem>>, %arg3: memref<256x32xbf16, #tpu.memory_space<vmem>>, %arg4: memref<256x32xbf16, #tpu.memory_space<vmem>>, %arg5: memref<256x1xf32, #tpu.memory_space<vmem>>) attributes {dimension_semantics = [#tpu.dimension_semantics<parallel>], iteration_bounds = array<i64: 2>, scalar_prefetch = 0 : i64, scratch_operands = 0 : i64, tpu.core_type = #tpu.core_type<tc>, window_params = [{transform_indices = @transform_0, window_bounds = array<i64: 256, 32>}, {transform_indices = @transform_1, window_bounds = array<i64: 256, 32>}, {transform_indices = @transform_2, window_bounds = array<i64: 256, 32>}, {transform_indices = @transform_3, window_bounds = array<i64: 256, 32>}, {transform_indices = @transform_4, window_bounds = array<i64: 256, 1>}]} {
    %c0 = arith.constant 0 : index
    %c0_0 = arith.constant 0 : index
    %0 = vector.load %arg1[%c0, %c0_0] : memref<256x32xbf16, #tpu.memory_space<vmem>>, vector<256x32xbf16>
    %1 = arith.extf %0 : vector<256x32xbf16> to vector<256x32xf32>
    %c0_1 = arith.constant 0 : index
    %c0_2 = arith.constant 0 : index
    %2 = vector.load %arg2[%c0_1, %c0_2] : memref<256x32xbf16, #tpu.memory_space<vmem>>, vector<256x32xbf16>
    %3 = arith.extf %2 : vector<256x32xbf16> to vector<256x32xf32>
    %c0_3 = arith.constant 0 : index
    %c0_4 = arith.constant 0 : index
    %4 = vector.load %arg3[%c0_3, %c0_4] : memref<256x32xbf16, #tpu.memory_space<vmem>>, vector<256x32xbf16>
    %5 = arith.extf %4 : vector<256x32xbf16> to vector<256x32xf32>
    %c0_5 = arith.constant 0 : index
    %c0_6 = arith.constant 0 : index
    %6 = vector.load %arg4[%c0_5, %c0_6] : memref<256x32xbf16, #tpu.memory_space<vmem>>, vector<256x32xbf16>
    %7 = arith.extf %6 : vector<256x32xbf16> to vector<256x32xf32>
    %8 = arith.mulf %5, %1 : vector<256x32xf32>
    %cst = arith.constant dense<0.000000e+00> : vector<256xf32>
    %9 = vector.multi_reduction <add>, %8, %cst [1] : vector<256x32xf32> to vector<256xf32>
    %10 = vector.shape_cast %9 : vector<256xf32> to vector<256x1xf32>
    %11 = vector.broadcast %10 : vector<256x1xf32> to vector<256x32xf32>
    %12 = arith.mulf %11, %5 : vector<256x32xf32>
    %13 = arith.subf %1, %12 : vector<256x32xf32>
    %14 = arith.mulf %5, %3 : vector<256x32xf32>
    %cst_7 = arith.constant dense<0.000000e+00> : vector<256xf32>
    %15 = vector.multi_reduction <add>, %14, %cst_7 [1] : vector<256x32xf32> to vector<256xf32>
    %16 = vector.shape_cast %15 : vector<256xf32> to vector<256x1xf32>
    %17 = vector.broadcast %16 : vector<256x1xf32> to vector<256x32xf32>
    %18 = arith.mulf %17, %5 : vector<256x32xf32>
    %19 = arith.subf %3, %18 : vector<256x32xf32>
    %20 = arith.addf %13, %7 : vector<256x32xf32>
    %21 = arith.subf %20, %19 : vector<256x32xf32>
    %22 = arith.mulf %21, %21 : vector<256x32xf32>
    %cst_8 = arith.constant dense<0.000000e+00> : vector<256xf32>
    %23 = vector.multi_reduction <add>, %22, %cst_8 [1] : vector<256x32xf32> to vector<256xf32>
    %24 = vector.shape_cast %23 : vector<256xf32> to vector<256x1xf32>
    %cst_9 = arith.constant 0.000000e+00 : f32
    %25 = vector.broadcast %cst_9 : f32 to vector<256x1xf32>
    %26 = arith.subf %25, %24 : vector<256x1xf32>
    %cst_10 = arith.constant 0.000000e+00 : f32
    %27 = vector.broadcast %cst_10 : f32 to vector<256x1xf32>
    %28 = arith.cmpf ogt, %26, %27 : vector<256x1xf32>
    %cst_11 = arith.constant 2.000000e-01 : f32
    %29 = vector.broadcast %cst_11 : f32 to vector<256x1xf32>
    %30 = arith.mulf %29, %26 : vector<256x1xf32>
    %31 = arith.select %28, %26, %30 : vector<256x1xi1>, vector<256x1xf32>
    %c0_12 = arith.constant 0 : index
    %c0_13 = arith.constant 0 : index
    %32 = vector.load %arg5[%c0_12, %c0_13] : memref<256x1xf32, #tpu.memory_space<vmem>>, vector<256x1xf32>
    tpu.vector_store %arg5[%c0_12, %c0_13], %31 {strides = array<i32>} : memref<256x1xf32, #tpu.memory_space<vmem>>, vector<256x1xf32>,
    return
  }
  func.func @transform_0(%arg0: i32) -> (i32, i32) {
    %c0_i32 = arith.constant 0 : i32
    %c0_i32_0 = arith.constant 0 : i32
    return %arg0, %c0_i32 : i32, i32
  }
  func.func @transform_1(%arg0: i32) -> (i32, i32) {
    %c0_i32 = arith.constant 0 : i32
    %c0_i32_0 = arith.constant 0 : i32
    return %arg0, %c0_i32 : i32, i32
  }
  func.func @transform_2(%arg0: i32) -> (i32, i32) {
    %c0_i32 = arith.constant 0 : i32
    %c0_i32_0 = arith.constant 0 : i32
    return %arg0, %c0_i32 : i32, i32
  }
  func.func @transform_3(%arg0: i32) -> (i32, i32) {
    %c0_i32 = arith.constant 0 : i32
    %c0_i32_0 = arith.constant 0 : i32
    return %arg0, %c0_i32 : i32, i32
  }
  func.func @transform_4(%arg0: i32) -> (i32, i32) {
    %c0_i32 = arith.constant 0 : i32
    %c0_i32_0 = arith.constant 0 : i32
    return %arg0, %c0_i32 : i32, i32
  }
}

</mosaic_0001>

<bundles_post_ra>
// kernel: tpu_custom_call.1
= control target key start
LH: loop header
LB: loop body
LE: loop exit
PB: predicated region body
PF: predicated region fallthrough
CT: control target
= control target key end

     0   :  { %s1727_s15 = smov 0   ;;  %s2685_s0 = inlined_call_operand.vmem [shape: bf16[512,32], index: 0, kind: input, shape index: {}]   ;;  %s2686_s1 = inlined_call_operand.vmem [shape: bf16[512,32], index: 1, kind: input, shape index: {}]   ;;  %s2687_s2 = inlined_call_operand.vmem [shape: bf16[512,32], index: 2, kind: input, shape index: {}]   ;;  %s2688_s3 = inlined_call_operand.vmem [shape: bf16[512,32], index: 3, kind: input, shape index: {}]   ;;  %s2689_s4 = inlined_call_operand.vmem [shape: f32[512,1], index: 4, kind: output, shape index: {}]  }
   0x1 LB: > { %s1353_s16 = sadd.s32 4294967295, %s1700_s15   ;;  %p1357_p0 = scmp.ge.s32.totalorder %s1700_s15, 1  ;;  %s1700_s15 = sphi %s1727_s15, %s14_s15  }
   0x2   : > { %p196_p1 = scmp.lt.s32.totalorder %s1700_s15, 3 }
   0x4   : > { %p197_p2 = pnand %p1357_p0, %p196_p1 }
   0x6   : > { %200 = sbr.rel (%p197_p2) target bundleno = 441 (0x1b9), region = 36 }
   0xb   : > { %s1358_s17 = sshll.u32 %s1353_s16, 5  ;;  %vm555_vm0 = vcmask 261120   ;;  %vm1228_vm1 = vcmask 7168  }
   0xc   : > { %p238_p3 = scmp.lt.s32.totalorder %s1358_s17, 63 }
   0xe   : > { %s2983_s17 = smov (!%p238_p3, %s1358_s17), 63 }
   0xf   : > { %s1738_s18 = sshll.u32 %s2983_s17, 2  ;;  %s1367_s5 = sshll.u32 %s2983_s17, 3 }
  0x10   : > { %s1744_s21 = scalar_lea.vmem %s2685_s0, %s1738_s18  ;;  %s1750_s24 = scalar_lea.vmem %s2687_s2, %s1738_s18 }
  0x11   : > { %v1753_v0 = vld [vmem:[%s1744_s21 + $0x10] sm:$0xff]   ;;  %v1757_v2 = vld [vmem:[%s1744_s21 + $0x8] sm:$0xff]   ;;  %v1765_v7 = vld [vmem:[%s1744_s21] sm:$0xff]   ;;  %s2014_s27 = scalar_lea.vmem %s2686_s1, %s1738_s18  ;;  %s2314_s30 = scalar_lea.vmem %s2688_s3, %s1738_s18 }
  0x12   : > { %v1657_v1 = vld [vmem:[%s1750_s24 + $0x10] sm:$0xff]   ;;  %v2715_v3 = vunpack.c.l.bf16 %v1753_v0  ;;  %v2721_v5 = vunpack.c.l.bf16 %v1757_v2  ;;  %v1656_v6 = vld [vmem:[%s1750_s24 + $0x8] sm:$0xff]   ;;  %v1499_v8 = vld [vmem:[%s1750_s24] sm:$0xff]   ;;  %v2726_v10 = vunpack.c.l.bf16 %v1765_v7  ;;  %v2712_v12 = vunpack.c.h.bf16 %v1753_v0  ;;  %s2616_s8 = scalar_lea.vmem %s2689_s4, %s1367_s5 }
  0x13   : > { %v1760_v4 = vunpack.c.l.bf16 %v1657_v1  ;;  %v1768_v9 = vunpack.c.l.bf16 %v1656_v6  ;;  %v1771_v11 = vunpack.c.l.bf16 %v1499_v8  ;;  %v1777_v14 = vunpack.c.h.bf16 %v1657_v1  ;;  %v1801_v26 = vld [vmem:[%s1744_s21 + $0x20] sm:$0xff]   ;;  %v1808_v29 = vld [vmem:[%s1744_s21 + $0x18] sm:$0xff]   ;;  %v1827_v41 = vld [vmem:[%s1744_s21 + $0x28] sm:$0xff]  }
  0x14   : > { %v2717_v15 = vunpack.c.h.bf16 %v1757_v2  ;;  %v1780_v16 = vunpack.c.h.bf16 %v1656_v6  ;;  %v2716_v19 = vunpack.c.h.bf16 %v1765_v7  ;;  %v1789_v20 = vunpack.c.h.bf16 %v1499_v8  ;;  %v1659_v28 = vld [vmem:[%s1750_s24 + $0x20] sm:$0xff]   ;;  %v1658_v30 = vld [vmem:[%s1750_s24 + $0x18] sm:$0xff]   ;;  %v1660_v44 = vld [vmem:[%s1750_s24 + $0x28] sm:$0xff]  }
  0x15   : > { %v527_v13 = vmul.f32 %v1760_v4, %v2715_v3  ;;  %v525_v17 = vmul.f32 %v1768_v9, %v2721_v5  ;;  %v523_v18 = vmul.f32 %v1771_v11, %v2726_v10  ;;  %v528_v24 = vmul.f32 %v1777_v14, %v2712_v12  ;;  %v1852_v55 = vld [vmem:[%s1744_s21 + $0x38] sm:$0xff]   ;;  %v1862_v59 = vld [vmem:[%s1744_s21 + $0x30] sm:$0xff]   ;;  %v2052_v3 = vld [vmem:[%s2014_s27 + $0x8] sm:$0xff]  }
  0x16   : > { %v526_v25 = vmul.f32 %v1780_v16, %v2717_v15  ;;  %v524_v27 = vmul.f32 %v1789_v20, %v2716_v19  ;;  %v2710_v31 = vunpack.c.l.bf16 %v1801_v26  ;;  %v1814_v34 = vunpack.c.l.bf16 %v1659_v28  ;;  %v1662_v58 = vld [vmem:[%s1750_s24 + $0x38] sm:$0xff]   ;;  %v1661_v60 = vld [vmem:[%s1750_s24 + $0x30] sm:$0xff]  }
  0x17   : > { %v568_v21 = vsel %vm555_vm0, %v527_v13, 0.0  ;;  %v562_v22 = vsel %vm555_vm0, %v525_v17, 0.0  ;;  %v556_v23 = vsel %vm555_vm0, %v523_v18, 0.0  ;;  %v571_v32 = vsel %vm555_vm0, %v528_v24, 0.0 }
  0x18   : > { %569 = vadd.xlane.f32.xlu2 %v568_v21  ;;  %563 = vadd.xlane.f32.xlu1 %v562_v22  ;;  %v565_v33 = vsel %vm555_vm0, %v526_v25, 0.0  ;;  %v2705_v35 = vunpack.c.h.bf16 %v1808_v29  ;;  %v559_v36 = vsel %vm555_vm0, %v524_v27, 0.0  ;;  %v1818_v37 = vunpack.c.h.bf16 %v1658_v30  ;;  %v1881_v22 = vld [vmem:[%s1744_s21 + $0x40] sm:$0xff]  }
  0x19   : > { %557 = vadd.xlane.f32.xlu0 %v556_v23  ;;  %v2714_v38 = vunpack.c.l.bf16 %v1808_v29  ;;  %v1821_v39 = vunpack.c.l.bf16 %v1658_v30  ;;  %v531_v40 = vmul.f32 %v1814_v34, %v2710_v31  ;;  %v2703_v45 = vunpack.c.h.bf16 %v1827_v41  ;;  %2820 = vst [vmem:[#allocation2_spill] sm:$0xff] %v1881_v22  ;;  %v1663_v25 = vld [vmem:[%s1750_s24 + $0x40] sm:$0xff]  }
  0x1a   : > { %v530_v42 = vmul.f32 %v1818_v37, %v2705_v35  ;;  %v1838_v47 = vunpack.c.h.bf16 %v1660_v44  ;;  %v2701_v48 = vunpack.c.l.bf16 %v1827_v41  ;;  %v1841_v49 = vunpack.c.l.bf16 %v1660_v44 }
  0x1b   : > { %v529_v43 = vmul.f32 %v1821_v39, %v2714_v38  ;;  %v580_v46 = vsel %vm555_vm0, %v531_v40, 0.0  ;;  %v2706_v52 = vunpack.c.h.bf16 %v1801_v26  ;;  %v1846_v53 = vunpack.c.h.bf16 %v1659_v28 }
  0x1c   : > { %v577_v50 = vsel %vm555_vm0, %v530_v42, 0.0  ;;  %v534_v54 = vmul.f32 %v1838_v47, %v2703_v45  ;;  %v533_v56 = vmul.f32 %v1841_v49, %v2701_v48  ;;  %v2700_v61 = vunpack.c.l.bf16 %v1852_v55 }
  0x1d   : > { %v574_v51 = vsel %vm555_vm0, %v529_v43, 0.0  ;;  %v532_v57 = vmul.f32 %v1846_v53, %v2706_v52  ;;  %v1867_v63 = vunpack.c.l.bf16 %v1662_v58  ;;  %v2697_v1 = vunpack.c.h.bf16 %v1862_v59 }
  0x1e   : > { %v589_v62 = vsel %vm555_vm0, %v534_v54, 0.0  ;;  %v1870_v6 = vunpack.c.h.bf16 %v1661_v60  ;;  %v586_v8 = vsel %vm555_vm0, %v533_v56, 0.0  ;;  %v2702_v17 = vunpack.c.l.bf16 %v1862_v59  ;;  %v1916_v56 = vld [vmem:[%s1744_s21 + $0x48] sm:$0xff]  }
  0x1f   : > { %v583_v13 = vsel %vm555_vm0, %v532_v57, 0.0  ;;  %v1875_v18 = vunpack.c.l.bf16 %v1661_v60  ;;  %v537_v21 = vmul.f32 %v1867_v63, %v2700_v61  ;;  %v2694_v27 = vunpack.c.h.bf16 %v1881_v22  ;;  %2824 = vst [vmem:[#allocation6_spill] sm:$0xff] %v1916_v56  ;;  %v1664_v57 = vld [vmem:[%s1750_s24 + $0x48] sm:$0xff]  }
  0x20   : > { %572 = vadd.xlane.f32.xlu2 %v571_v32  ;;  %566 = vadd.xlane.f32.xlu1 %v565_v33  ;;  %v536_v23 = vmul.f32 %v1870_v6, %v2697_v1  ;;  %v1892_v30 = vunpack.c.h.bf16 %v1663_v25  ;;  %v2692_v32 = vunpack.c.l.bf16 %v1881_v22  ;;  %v1895_v33 = vunpack.c.l.bf16 %v1663_v25 }
  0x21   : > { %560 = vadd.xlane.f32.xlu0 %v559_v36  ;;  %v535_v24 = vmul.f32 %v1875_v18, %v2702_v17  ;;  %v598_v28 = vsel %vm555_vm0, %v537_v21, 0.0  ;;  %v2699_v42 = vunpack.c.h.bf16 %v1852_v55  ;;  %v1900_v43 = vunpack.c.h.bf16 %v1662_v58 }
  0x22   : > { %2821 = vst [vmem:[#allocation3_spill] sm:$0xff] %v1892_v30  ;;  %v595_v36 = vsel %vm555_vm0, %v536_v23, 0.0  ;;  %v540_v44 = vmul.f32 %v1892_v30, %v2694_v27  ;;  %v1929_v25 = vunpack.c.l.bf16 %v1664_v57  ;;  %v1966_v27 = vld [vmem:[%s1744_s21 + $0x68] sm:$0xff]   ;;  %v2722_v19 = vunpack.c.l.bf16 %v2052_v3 }
  0x23   : > { %2822 = vst [vmem:[#allocation4_spill] sm:$0xff] %v1895_v33  ;;  %v592_v40 = vsel %vm555_vm0, %v535_v24, 0.0  ;;  %v538_v54 = vmul.f32 %v1900_v43, %v2699_v42  ;;  %v2693_v24 = vunpack.c.l.bf16 %v1916_v56  ;;  %v2713_v35 = vunpack.c.h.bf16 %v1966_v27 }
  0x24   : > { %2827 = vst [vmem:[#allocation9_spill] sm:$0xff] %v1929_v25 }
  0x25   : > { %v601_v23 = vsel %vm555_vm0, %v538_v54, 0.0  ;;  %2832 = vst [vmem:[#allocation14_spill] sm:$0xff] %v1966_v27 }
  0x28   : > { %581 = vadd.xlane.f32.xlu2 %v580_v46  ;;  %578 = vadd.xlane.f32.xlu1 %v577_v50  ;;  %v1906_v46 = vld [vmem:[%s1744_s21 + $0x50] sm:$0xff]  }
  0x29   : > { %575 = vadd.xlane.f32.xlu0 %v574_v51  ;;  %2823 = vst [vmem:[#allocation5_spill] sm:$0xff] %v1906_v46  ;;  %v1665_v50 = vld [vmem:[%s1750_s24 + $0x50] sm:$0xff]   ;;  %v539_v51 = vmul.f32 %v1895_v33, %v2692_v32  ;;  %v2691_v58 = vunpack.c.l.bf16 %v1906_v46 }
  0x2a   : > { %v1920_v60 = vunpack.c.l.bf16 %v1665_v50 }
  0x2b   : > { %v604_v21 = vsel %vm555_vm0, %v539_v51, 0.0  ;;  %v541_v51 = vmul.f32 %v1929_v25, %v2693_v24 }
  0x2c   : > { %2825 = vst [vmem:[#allocation7_spill] sm:$0xff] %v1920_v60 }
  0x2d   : > { %v610_v24 = vsel %vm555_vm0, %v541_v51, 0.0  ;;  %v1970_v51 = vld [vmem:[%s1744_s21 + $0x60] sm:$0xff]  }
  0x2e   : > { %2833 = vst [vmem:[#allocation15_spill] sm:$0xff] %v1970_v51  ;;  %v2708_v61 = vunpack.c.l.bf16 %v1970_v51 }
  0x30   : > { %590 = vadd.xlane.f32.xlu2 %v589_v62  ;;  %587 = vadd.xlane.f32.xlu1 %v586_v8  ;;  %v607_v62 = vsel %vm555_vm0, %v540_v44, 0.0  ;;  %v2690_v8 = vunpack.c.h.bf16 %v1916_v56 }
  0x31   : > { %584 = vadd.xlane.f32.xlu0 %v583_v13  ;;  %v1924_v13 = vunpack.c.h.bf16 %v1664_v57 }
  0x33   : > { %2826 = vst [vmem:[#allocation8_spill] sm:$0xff] %v1924_v13  ;;  %v542_v44 = vmul.f32 %v1924_v13, %v2690_v8  ;;  %v2698_v8 = vunpack.c.h.bf16 %v1906_v46 }
  0x35   : > { %v613_v32 = vsel %vm555_vm0, %v542_v44, 0.0  ;;  %v1668_v44 = vld [vmem:[%s1750_s24 + $0x68] sm:$0xff]  }
  0x36   : > { %v2006_v52 = vunpack.c.h.bf16 %v1668_v44 }
  0x38   : > { %599 = vadd.xlane.f32.xlu2 %v598_v28  ;;  %596 = vadd.xlane.f32.xlu1 %v595_v36  ;;  %v543_v28 = vmul.f32 %v1920_v60, %v2691_v58  ;;  %v1935_v36 = vld [vmem:[%s1744_s21 + $0x58] sm:$0xff]   ;;  %v1952_v58 = vunpack.c.h.bf16 %v1665_v50  ;;  %2840 = vst [vmem:[#allocation22_spill] sm:$0xff] %v2006_v52 }
  0x39   : > { %593 = vadd.xlane.f32.xlu0 %v592_v40  ;;  %2828 = vst [vmem:[#allocation10_spill] sm:$0xff] %v1935_v36  ;;  %v1666_v40 = vld [vmem:[%s1750_s24 + $0x58] sm:$0xff]   ;;  %v2695_v57 = vunpack.c.h.bf16 %v1935_v36 }
  0x3a   : > { %v616_v54 = vsel %vm555_vm0, %v543_v28, 0.0  ;;  %2831 = vst [vmem:[#allocation13_spill] sm:$0xff] %v1952_v58  ;;  %v544_v50 = vmul.f32 %v1952_v58, %v2698_v8  ;;  %v2707_v8 = vunpack.c.h.bf16 %v1970_v51 }
  0x3c   : > { %v619_v1 = vsel %vm555_vm0, %v544_v50, 0.0 }
  0x40   : > { %608 = vadd.xlane.f32.xlu2 %v607_v62  ;;  %605 = vadd.xlane.f32.xlu1 %v604_v21  ;;  %v1946_v62 = vunpack.c.h.bf16 %v1666_v40  ;;  %v2696_v21 = vunpack.c.l.bf16 %v1935_v36 }
  0x41   : > { %602 = vadd.xlane.f32.xlu0 %v601_v23  ;;  %v1949_v23 = vunpack.c.l.bf16 %v1666_v40 }
  0x42   : > { %2829 = vst [vmem:[#allocation11_spill] sm:$0xff] %v1946_v62  ;;  %v546_v28 = vmul.f32 %v1946_v62, %v2695_v57 }
  0x43   : > { %2830 = vst [vmem:[#allocation12_spill] sm:$0xff] %v1949_v23  ;;  %v545_v40 = vmul.f32 %v1949_v23, %v2696_v21 }
  0x44   : > { %v625_v57 = vsel %vm555_vm0, %v546_v28, 0.0  ;;  %v1989_v28 = vld [vmem:[%s1744_s21 + $0x70] sm:$0xff]  }
  0x45   : > { %v622_v21 = vsel %vm555_vm0, %v545_v40, 0.0  ;;  %2837 = vst [vmem:[#allocation19_spill] sm:$0xff] %v1989_v28  ;;  %v1669_v40 = vld [vmem:[%s1750_s24 + $0x70] sm:$0xff]   ;;  %v2709_v45 = vunpack.c.h.bf16 %v1989_v28 }
  0x48   : > { %617 = vadd.xlane.f32.xlu2 %v616_v54  ;;  %614 = vadd.xlane.f32.xlu1 %v613_v32  ;;  %v1667_v32 = vld [vmem:[%s1750_s24 + $0x60] sm:$0xff]   ;;  %v1974_v54 = vunpack.c.l.bf16 %v1668_v44 }
  0x49   : > { %611 = vadd.xlane.f32.xlu0 %v610_v24  ;;  %v2704_v24 = vunpack.c.l.bf16 %v1966_v27  ;;  %v1980_v42 = vunpack.c.h.bf16 %v1667_v32  ;;  %v1983_v48 = vunpack.c.l.bf16 %v1667_v32 }
  0x4a   : > { %2834 = vst [vmem:[#allocation16_spill] sm:$0xff] %v1974_v54 }
  0x4b   : > { %2835 = vst [vmem:[#allocation17_spill] sm:$0xff] %v1980_v42  ;;  %v549_v17 = vmul.f32 %v1974_v54, %v2704_v24  ;;  %v548_v50 = vmul.f32 %v1980_v42, %v2707_v8  ;;  %v547_v32 = vmul.f32 %v1983_v48, %v2708_v61  ;;  %v2000_v24 = vunpack.c.h.bf16 %v1669_v40 }
  0x4c   : > { %2836 = vst [vmem:[#allocation18_spill] sm:$0xff] %v1983_v48 }
  0x4d   : > { %2838 = vst [vmem:[#allocation20_spill] sm:$0xff] %v2000_v24  ;;  %v631_v8 = vsel %vm555_vm0, %v548_v50, 0.0  ;;  %v628_v61 = vsel %vm555_vm0, %v547_v32, 0.0  ;;  %v2026_v50 = vld [vmem:[%s2014_s27] sm:$0xff]   ;;  %v2029_v32 = vld [vmem:[%s1744_s21 + $0x78] sm:$0xff]  }
  0x4e   : > { %2841 = vst [vmem:[#allocation23_spill] sm:$0xff] %v2029_v32  ;;  %v2725_v31 = vunpack.c.l.bf16 %v2026_v50  ;;  %v2723_v15 = vunpack.c.h.bf16 %v2026_v50 }
  0x50   : > { %626 = vadd.xlane.f32.xlu2 %v625_v57  ;;  %623 = vadd.xlane.f32.xlu1 %v622_v21  ;;  %v634_v57 = vsel %vm555_vm0, %v549_v17, 0.0  ;;  %v2003_v21 = vunpack.c.l.bf16 %v1669_v40  ;;  %v552_v17 = vmul.f32 %v2000_v24, %v2709_v45  ;;  %v550_v40 = vmul.f32 %v2006_v52, %v2713_v35 }
  0x51   : > { %620 = vadd.xlane.f32.xlu0 %v619_v1  ;;  %v2711_v1 = vunpack.c.l.bf16 %v1989_v28  ;;  %v2719_v35 = vunpack.c.l.bf16 %v2029_v32 }
  0x52   : > { %2839 = vst [vmem:[#allocation21_spill] sm:$0xff] %v2003_v21  ;;  %v637_v45 = vsel %vm555_vm0, %v550_v40, 0.0 }
  0x53   : > { %v551_v44 = vmul.f32 %v2003_v21, %v2711_v1  ;;  %v2718_v1 = vunpack.c.h.bf16 %v2029_v32 }
  0x58   : > { %635 = vadd.xlane.f32.xlu2 %v634_v57  ;;  %632 = vadd.xlane.f32.xlu1 %v631_v8  ;;  %v1670_v57 = vld [vmem:[%s1750_s24 + $0x78] sm:$0xff]   ;;  %v640_v8 = vsel %vm555_vm0, %v551_v44, 0.0 }
  0x59   : > { %629 = vadd.xlane.f32.xlu0 %v628_v61  ;;  %v643_v61 = vsel %vm555_vm0, %v552_v17, 0.0  ;;  %v2037_v12 = vunpack.c.h.bf16 %v1670_v57  ;;  %v2040_v38 = vunpack.c.l.bf16 %v1670_v57  ;;  %v716_v17 = vmul.f32 %v1771_v11, %v2725_v31 }
  0x5b   : > { %2842 = vst [vmem:[#allocation24_spill] sm:$0xff] %v2037_v12  ;;  %v554_v44 = vmul.f32 %v2037_v12, %v2718_v1  ;;  %v553_v40 = vmul.f32 %v2040_v38, %v2719_v35  ;;  %v748_v57 = vsel %vm555_vm0, %v716_v17, 0.0  ;;  %v718_v17 = vmul.f32 %v1768_v9, %v2722_v19  ;;  %v2073_v35 = vld [vmem:[%s2014_s27 + $0x10] sm:$0xff]  }
  0x5c   : > { %2843 = vst [vmem:[#allocation25_spill] sm:$0xff] %v2040_v38  ;;  %v2728_v5 = vunpack.c.h.bf16 %v2073_v35  ;;  %v2727_v19 = vunpack.c.l.bf16 %v2073_v35 }
  0x60   : > { %644 = vadd.xlane.f32.xlu2 %v643_v61  ;;  %641 = vadd.xlane.f32.xlu1 %v640_v8  ;;  %v649_v61 = vsel %vm555_vm0, %v554_v44, 0.0  ;;  %v646_v8 = vsel %vm555_vm0, %v553_v40, 0.0  ;;  %v717_v44 = vmul.f32 %v1789_v20, %v2723_v15  ;;  %v2070_v40 = vld [vmem:[%s2014_s27 + $0x18] sm:$0xff]  }
  0x61   : > { %638 = vadd.xlane.f32.xlu0 %v637_v45  ;;  %v2720_v45 = vunpack.c.h.bf16 %v2052_v3  ;;  %v2733_v10 = vunpack.c.h.bf16 %v2070_v40 }
  0x63   : > { %v719_v1 = vmul.f32 %v1780_v16, %v2720_v45  ;;  %v751_v45 = vsel %vm555_vm0, %v717_v44, 0.0  ;;  %v2091_v44 = vld [vmem:[%s2014_s27 + $0x20] sm:$0xff]  }
  0x64   : > { %v2732_v31 = vunpack.c.l.bf16 %v2091_v44 }
  0x68   : > { %749 = vadd.xlane.f32.xlu2 %v748_v57  ;;  %650 = vadd.xlane.f32.xlu1 %v649_v61  ;;  %v757_v57 = vsel %vm555_vm0, %v719_v1, 0.0  ;;  %v2724_v61 = vunpack.c.l.bf16 %v2070_v40  ;;  %v721_v1 = vmul.f32 %v1777_v14, %v2728_v5  ;;  %v2112_v5 = vld [vmem:[%s2014_s27 + $0x28] sm:$0xff]  }
  0x69   : > { %647 = vadd.xlane.f32.xlu0 %v646_v8  ;;  %v754_v8 = vsel %vm555_vm0, %v718_v17, 0.0  ;;  %v720_v17 = vmul.f32 %v1760_v4, %v2727_v19  ;;  %v2740_v32 = vunpack.c.h.bf16 %v2112_v5 }
  0x6a   : > { %v722_v15 = vmul.f32 %v1821_v39, %v2724_v61 }
  0x6b   : > { %v760_v61 = vsel %vm555_vm0, %v720_v17, 0.0  ;;  %v2109_v17 = vld [vmem:[%s2014_s27 + $0x30] sm:$0xff]  }
  0x6c   : > { %v2747_v27 = vunpack.c.h.bf16 %v2109_v17 }
  0x70   : > { %758 = vadd.xlane.f32.xlu2 %v757_v57  ;;  %755 = vadd.xlane.f32.xlu1 %v754_v8  ;;  %v766_v57 = vsel %vm555_vm0, %v722_v15, 0.0  ;;  %v763_v8 = vsel %vm555_vm0, %v721_v1, 0.0  ;;  %v724_v15 = vmul.f32 %v1814_v34, %v2732_v31  ;;  %v723_v1 = vmul.f32 %v1818_v37, %v2733_v10 }
  0x71   : > { %752 = vadd.xlane.f32.xlu0 %v751_v45  ;;  %v2729_v45 = vunpack.c.h.bf16 %v2091_v44  ;;  %v2739_v31 = vunpack.c.l.bf16 %v2112_v5 }
  0x73   : > { %v725_v19 = vmul.f32 %v1846_v53, %v2729_v45  ;;  %v769_v45 = vsel %vm555_vm0, %v723_v1, 0.0  ;;  %v2130_v1 = vld [vmem:[%s2014_s27 + $0x38] sm:$0xff]  }
  0x74   : > { %2844 = vst [vmem:[#allocation26_spill] sm:$0xff] %v2130_v1  ;;  %v2744_v28 = vunpack.c.l.bf16 %v2130_v1 }
  0x78   : > { %767 = vadd.xlane.f32.xlu2 %v766_v57  ;;  %764 = vadd.xlane.f32.xlu1 %v763_v8  ;;  %v775_v57 = vsel %vm555_vm0, %v725_v19, 0.0  ;;  %v772_v8 = vsel %vm555_vm0, %v724_v15, 0.0  ;;  %v727_v19 = vmul.f32 %v1838_v47, %v2740_v32  ;;  %v726_v15 = vmul.f32 %v1841_v49, %v2739_v31 }
  0x79   : > { %761 = vadd.xlane.f32.xlu0 %v760_v61  ;;  %v2734_v61 = vunpack.c.l.bf16 %v2109_v17 }
  0x7b   : > { %v728_v10 = vmul.f32 %v1875_v18, %v2734_v61  ;;  %v778_v61 = vsel %vm555_vm0, %v726_v15, 0.0  ;;  %v2148_v15 = vld [vmem:[%s2014_s27 + $0x48] sm:$0xff]  }
  0x7c   : > { %2845 = vst [vmem:[#allocation27_spill] sm:$0xff] %v2148_v15  ;;  %v2754_v51 = vunpack.c.l.bf16 %v2148_v15 }
  0x7e   : > { %v734_v56 = vmul.f32 %v1929_v25, %v2754_v51 }
  0x80   : > { %776 = vadd.xlane.f32.xlu2 %v775_v57  ;;  %773 = vadd.xlane.f32.xlu1 %v772_v8  ;;  %v784_v57 = vsel %vm555_vm0, %v728_v10, 0.0  ;;  %v781_v8 = vsel %vm555_vm0, %v727_v19, 0.0  ;;  %v730_v10 = vmul.f32 %v1867_v63, %v2744_v28  ;;  %v729_v19 = vmul.f32 %v1870_v6, %v2747_v27 }
  0x81   : > { %770 = vadd.xlane.f32.xlu0 %v769_v45  ;;  %v2741_v45 = vunpack.c.h.bf16 %v2130_v1 }
  0x82   : > { %v790_v28 = vsel %vm555_vm0, %v730_v10, 0.0  ;;  %v787_v36 = vsel %vm555_vm0, %v729_v19, 0.0  ;;  %v2175_v19 = vld [vmem:[%s2014_s27 + $0x50] sm:$0xff]  }
  0x83   : > { %v731_v31 = vmul.f32 %v1900_v43, %v2741_v45  ;;  %2847 = vst [vmem:[#allocation29_spill] sm:$0xff] %v2175_v19  ;;  %v2765_v51 = vunpack.c.h.bf16 %v2175_v19 }
  0x85   : > { %v793_v45 = vsel %vm555_vm0, %v731_v31, 0.0  ;;  %v737_v1 = vmul.f32 %v1952_v58, %v2765_v51 }
  0x87   : > { %v811_v51 = vsel %vm555_vm0, %v737_v1, 0.0 }
  0x88   : > { %785 = vadd.xlane.f32.xlu2 %v784_v57  ;;  %782 = vadd.xlane.f32.xlu1 %v781_v8  ;;  %v2153_v57 = vld [vmem:[%s2014_s27 + $0x40] sm:$0xff]  }
  0x89   : > { %779 = vadd.xlane.f32.xlu0 %v778_v61  ;;  %2846 = vst [vmem:[#allocation28_spill] sm:$0xff] %v2153_v57  ;;  %v2755_v27 = vunpack.c.h.bf16 %v2153_v57  ;;  %v2758_v46 = vunpack.c.l.bf16 %v2153_v57 }
  0x8b   : > { %v2150_v32 = vpop.xlane.xlu2 %569  ;;  %v2155_v61 = vpop.xlane.xlu1 %563  ;;  %v733_v31 = vmul.f32 %v1892_v30, %v2755_v27  ;;  %v732_v10 = vmul.f32 %v1895_v33, %v2758_v46  ;;  %v2768_v46 = vunpack.c.l.bf16 %v2175_v19  ;;  %v2771_v33 = vunpack.c.h.bf16 %v2148_v15  ;;  %v2255_v30 = vld [vmem:[%s2014_s27 + $0x70] sm:$0xff]  }
  0x8c   : > { %v2157_v8 = vpop.xlane.xlu0 %557  ;;  %2852 = vst [vmem:[#allocation34_spill] sm:$0xff] %v2255_v30 }
  0x8d   : > { %v799_v27 = vsel %vm555_vm0, %v733_v31, 0.0  ;;  %v796_v57 = vsel %vm555_vm0, %v732_v10, 0.0  ;;  %v735_v31 = vmul.f32 %v1924_v13, %v2771_v33  ;;  %v2199_v10 = vld [vmem:[%s2014_s27 + $0x60] sm:$0xff]  }
  0x8e   : > { %2848 = vst [vmem:[#allocation30_spill] sm:$0xff] %v2199_v10  ;;  %v2778_v19 = vunpack.c.l.bf16 %v2199_v10 }
  0x8f   : > { %v805_v15 = vsel %vm555_vm0, %v735_v31, 0.0  ;;  %v2226_v31 = vld [vmem:[%s2014_s27 + $0x68] sm:$0xff]  }
  0x90   : > { %794 = vadd.xlane.f32.xlu2 %v793_v45  ;;  %791 = vadd.xlane.f32.xlu1 %v790_v28  ;;  %v802_v28 = vsel %vm555_vm0, %v734_v56, 0.0  ;;  %v736_v56 = vmul.f32 %v1920_v60, %v2768_v46  ;;  %v740_v58 = vmul.f32 %v1983_v48, %v2778_v19  ;;  %2850 = vst [vmem:[#allocation32_spill] sm:$0xff] %v2226_v31  ;;  %v2791_v19 = vunpack.c.h.bf16 %v2226_v31 }
  0x91   : > { %788 = vadd.xlane.f32.xlu0 %v787_v36 }
  0x92   : > { %v808_v46 = vsel %vm555_vm0, %v736_v56, 0.0  ;;  %v743_v48 = vmul.f32 %v2006_v52, %v2791_v19 }
  0x93   : > { %v2177_v22 = vpop.xlane.xlu2 %572  ;;  %v2179_v45 = vpop.xlane.xlu1 %566 }
  0x94   : > { %v2181_v36 = vpop.xlane.xlu0 %560 }
  0x98   : > { %803 = vadd.xlane.f32.xlu2 %v802_v28  ;;  %800 = vadd.xlane.f32.xlu1 %v799_v27  ;;  %v2204_v28 = vld [vmem:[%s2014_s27 + $0x58] sm:$0xff]  }
  0x99   : > { %797 = vadd.xlane.f32.xlu0 %v796_v57  ;;  %2849 = vst [vmem:[#allocation31_spill] sm:$0xff] %v2204_v28  ;;  %v2779_v33 = vunpack.c.h.bf16 %v2204_v28  ;;  %v2782_v13 = vunpack.c.l.bf16 %v2204_v28 }
  0x9b   : > { %v2201_v25 = vpop.xlane.xlu2 %581  ;;  %v2206_v27 = vpop.xlane.xlu1 %578  ;;  %v739_v1 = vmul.f32 %v1946_v62, %v2779_v33  ;;  %v738_v56 = vmul.f32 %v1949_v23, %v2782_v13  ;;  %v2792_v13 = vunpack.c.l.bf16 %v2226_v31  ;;  %v2795_v23 = vunpack.c.h.bf16 %v2199_v10 }
  0x9c   : > { %v2208_v57 = vpop.xlane.xlu0 %575 }
  0x9d   : > { %v817_v33 = vsel %vm555_vm0, %v739_v1, 0.0  ;;  %v814_v28 = vsel %vm555_vm0, %v738_v56, 0.0  ;;  %v741_v1 = vmul.f32 %v1980_v42, %v2795_v23  ;;  %v2250_v56 = vld [vmem:[%s2014_s27 + $0x78] sm:$0xff]   ;;  %v2806_v23 = vunpack.c.h.bf16 %v2255_v30 }
  0x9e   : > { %2851 = vst [vmem:[#allocation33_spill] sm:$0xff] %v2250_v56  ;;  %v2804_v19 = vunpack.c.l.bf16 %v2250_v56  ;;  %v2805_v42 = vunpack.c.l.bf16 %v2255_v30 }
  0x9f   : > { %v823_v31 = vsel %vm555_vm0, %v741_v1, 0.0 }
  0xa0   : > { %812 = vadd.xlane.f32.xlu2 %v811_v51  ;;  %809 = vadd.xlane.f32.xlu1 %v808_v46  ;;  %v746_v10 = vmul.f32 %v2040_v38, %v2804_v19  ;;  %v2811_v19 = vunpack.c.h.bf16 %v2250_v56  ;;  %v652_v56 = vmul.f32 %v1771_v11, %v2157_v8  ;;  %v1563_v38 = vld [vmem:[%s2314_s30] sm:$0xff]   ;;  %v655_v8 = vmul.f32 %v1780_v16, %v2179_v45 }
  0xa1   : > { %806 = vadd.xlane.f32.xlu0 %v805_v15  ;;  %v820_v15 = vsel %vm555_vm0, %v740_v58, 0.0  ;;  %v742_v58 = vmul.f32 %v1974_v54, %v2792_v13  ;;  %v2873_v45 = vunpack.c.h.bf16 %v1765_v7 }
  0xa3   : > { %v2228_v60 = vpop.xlane.xlu2 %590  ;;  %v2230_v51 = vpop.xlane.xlu1 %587  ;;  %v826_v13 = vsel %vm555_vm0, %v742_v58, 0.0  ;;  %v744_v58 = vmul.f32 %v2003_v21, %v2805_v42  ;;  %v747_v42 = vmul.f32 %v2037_v12, %v2811_v19 }
  0xa4   : > { %v2232_v46 = vpop.xlane.xlu0 %584 }
  0xa8   : > { %821 = vadd.xlane.f32.xlu2 %v820_v15  ;;  %818 = vadd.xlane.f32.xlu1 %v817_v33  ;;  %v829_v15 = vsel %vm555_vm0, %v743_v48, 0.0  ;;  %v745_v48 = vmul.f32 %v2000_v24, %v2806_v23  ;;  %v1564_v24 = vunpack.c.l.bf16 %v1563_v38 }
  0xa9   : > { %815 = vadd.xlane.f32.xlu0 %v814_v28 }
  0xab   : > { %v2252_v62 = vpop.xlane.xlu2 %599  ;;  %v2257_v33 = vpop.xlane.xlu1 %596 }
  0xac   : > { %v2259_v28 = vpop.xlane.xlu0 %593 }
  0xb0   : > { %830 = vadd.xlane.f32.xlu2 %v829_v15  ;;  %827 = vadd.xlane.f32.xlu1 %v826_v13  ;;  %v838_v13 = vsel %vm555_vm0, %v746_v10, 0.0  ;;  %v832_v15 = vsel %vm555_vm0, %v744_v58, 0.0  ;;  %v841_v10 = vsel %vm555_vm0, %v747_v42, 0.0 }
  0xb1   : > { %824 = vadd.xlane.f32.xlu0 %v823_v31  ;;  %v835_v31 = vsel %vm555_vm0, %v745_v48, 0.0 }
  0xb3   : > { %v2276_v1 = vpop.xlane.xlu2 %608  ;;  %v2278_v52 = vpop.xlane.xlu1 %605 }
  0xb4   : > { %2853 = vst [vmem:[#allocation35_spill] sm:$0xff] %v2276_v1  ;;  %v2280_v54 = vpop.xlane.xlu0 %602 }
  0xb5   : > { %2854 = vst [vmem:[#allocation36_spill] sm:$0xff] %v2278_v52  ;;  %v2872_v52 = vunpack.c.h.bf16 %v1757_v2 }
  0xb8   : > { %839 = vadd.xlane.f32.xlu2 %v838_v13  ;;  %836 = vadd.xlane.f32.xlu1 %v835_v31 }
  0xb9   : > { %833 = vadd.xlane.f32.xlu0 %v832_v15 }
  0xbb   : > { %v2289_v23 = vpop.xlane.xlu2 %617  ;;  %v2291_v30 = vpop.xlane.xlu1 %614 }
  0xbc   : > { %2855 = vst [vmem:[#allocation37_spill] sm:$0xff] %v2289_v23  ;;  %v2293_v21 = vpop.xlane.xlu0 %611 }
  0xbd   : > { %2856 = vst [vmem:[#allocation38_spill] sm:$0xff] %v2291_v30  ;;  %v1671_v30 = vld [vmem:[%s2314_s30 + $0x8] sm:$0xff]  }
  0xbe   : > { %2857 = vst [vmem:[#allocation39_spill] sm:$0xff] %v2293_v21 }
  0xc1   : > { %842 = vadd.xlane.f32.xlu0 %v841_v10 }
  0xc3   : > { %v2296_v48 = vpop.xlane.xlu2 %626  ;;  %v2298_v58 = vpop.xlane.xlu1 %623 }
  0xc4   : > { %2858 = vst [vmem:[#allocation40_spill] sm:$0xff] %v2296_v48  ;;  %v2300_v13 = vpop.xlane.xlu0 %620 }
  0xc5   : > { %2859 = vst [vmem:[#allocation41_spill] sm:$0xff] %v2298_v58 }
  0xc6   : > { %2860 = vst [vmem:[#allocation42_spill] sm:$0xff] %v2300_v13  ;;  %v2870_v13 = vunpack.c.l.bf16 %v2026_v50 }
  0xcb   : > { %v2302_v31 = vpop.xlane.xlu2 %635  ;;  %v2304_v15 = vpop.xlane.xlu1 %632 }
  0xcc   : > { %2861 = vst [vmem:[#allocation43_spill] sm:$0xff] %v2302_v31  ;;  %v2306_v19 = vpop.xlane.xlu0 %629 }
  0xcd   : > { %2862 = vst [vmem:[#allocation44_spill] sm:$0xff] %v2304_v15  ;;  %v2867_v15 = vunpack.c.l.bf16 %v1765_v7 }
  0xce   : > { %2863 = vst [vmem:[#allocation45_spill] sm:$0xff] %v2306_v19 }
  0xcf   : > { %v684_v31 = vsub.f32 %v2867_v15, %v652_v56  ;;  %v653_v56 = vmul.f32 %v1789_v20, %v2181_v36  ;;  %v2871_v15 = vunpack.c.l.bf16 %v1757_v2 }
  0xd1   : > { %v685_v21 = vsub.f32 %v2873_v45, %v653_v56  ;;  %v2359_v56 = vld [vmem:[%s2314_s30 + $0x18] sm:$0xff]  }
  0xd2   : > { %v1576_v45 = vunpack.c.l.bf16 %v2359_v56 }
  0xd3   : > { %v2308_v12 = vpop.xlane.xlu2 %644  ;;  %v2316_v42 = vpop.xlane.xlu1 %641 }
  0xd4   : > { %2864 = vst [vmem:[#allocation46_spill] sm:$0xff] %v2308_v12  ;;  %v2318_v10 = vpop.xlane.xlu0 %638 }
  0xd5   : > { %2865 = vst [vmem:[#allocation47_spill] sm:$0xff] %v2316_v42  ;;  %v654_v42 = vmul.f32 %v1768_v9, %v2155_v61  ;;  %v687_v61 = vsub.f32 %v2872_v52, %v655_v8  ;;  %v2874_v8 = vunpack.c.h.bf16 %v2052_v3 }
  0xd6   : > { %2866 = vst [vmem:[#allocation48_spill] sm:$0xff] %v2318_v10  ;;  %v908_v10 = vadd.f32 %v1564_v24, %v684_v31  ;;  %v1565_v31 = vunpack.c.h.bf16 %v1563_v38 }
  0xdb   : > { %v750_v12 = vpop.xlane.xlu2 %749  ;;  %v2326_v19 = vpop.xlane.xlu1 %650 }
  0xdc   : > { %v844_v58 = vmul.f32 %v1771_v11, %v750_v12  ;;  %2868 = vst [vmem:[#allocation49_spill] sm:$0xff] %v2326_v19  ;;  %v2328_v48 = vpop.xlane.xlu0 %647  ;;  %v1568_v12 = vunpack.c.l.bf16 %v1671_v30  ;;  %v686_v19 = vsub.f32 %v2871_v15, %v654_v42 }
  0xdd   : > { %2869 = vst [vmem:[#allocation50_spill] sm:$0xff] %v2328_v48  ;;  %v1569_v48 = vunpack.c.h.bf16 %v1671_v30  ;;  %v1672_v30 = vld [vmem:[%s2314_s30 + $0x10] sm:$0xff]  }
  0xde   : > { %v876_v23 = vsub.f32 %v2870_v13, %v844_v58  ;;  %v656_v58 = vmul.f32 %v1760_v4, %v2150_v32  ;;  %v910_v38 = vadd.f32 %v1568_v12, %v686_v19  ;;  %v1572_v19 = vunpack.c.l.bf16 %v1672_v30 }
  0xdf   : > { %v911_v7 = vadd.f32 %v1569_v48, %v687_v61  ;;  %v2877_v48 = vunpack.c.l.bf16 %v1753_v0 }
  0xe0   : > { %v940_v11 = vsub.f32 %v908_v10, %v876_v23  ;;  %v658_v10 = vmul.f32 %v1821_v39, %v2208_v57 }
  0xe1   : > { %v688_v12 = vsub.f32 %v2877_v48, %v656_v58  ;;  %v660_v58 = vmul.f32 %v1814_v34, %v2201_v25  ;;  %v661_v25 = vmul.f32 %v1846_v53, %v2232_v46 }
  0xe2   : > { %v972_v24 = vmul.f32 %v940_v11, %v940_v11  ;;  %v2875_v11 = vunpack.c.l.bf16 %v2052_v3  ;;  %v2879_v3 = vunpack.c.h.bf16 %v1753_v0 }
  0xe3   : > { %v759_v1 = vpop.xlane.xlu2 %758  ;;  %v756_v36 = vpop.xlane.xlu1 %755 }
  0xe4   : > { %v847_v23 = vmul.f32 %v1780_v16, %v759_v1  ;;  %v753_v13 = vpop.xlane.xlu0 %752  ;;  %v1004_v42 = vsel %vm555_vm0, %v972_v24, 0.0  ;;  %v846_v2 = vmul.f32 %v1768_v9, %v756_v36  ;;  %v657_v16 = vmul.f32 %v1777_v14, %v2177_v22 }
  0xe5   : > { %v845_v52 = vmul.f32 %v1789_v20, %v753_v13  ;;  %1005 = vadd.xlane.f32.xlu1 %v1004_v42  ;;  %v909_v1 = vadd.f32 %v1565_v31, %v685_v21  ;;  %v2876_v20 = vunpack.c.h.bf16 %v2026_v50  ;;  %v2878_v22 = vunpack.c.l.bf16 %v1808_v29 }
  0xe6   : > { %v879_v32 = vsub.f32 %v2874_v8, %v847_v23  ;;  %v878_v9 = vsub.f32 %v2875_v11, %v846_v2  ;;  %v1573_v23 = vunpack.c.h.bf16 %v1672_v30  ;;  %v689_v36 = vsub.f32 %v2879_v3, %v657_v16 }
  0xe7   : > { %v877_v15 = vsub.f32 %v2876_v20, %v845_v52  ;;  %v690_v21 = vsub.f32 %v2878_v22, %v658_v10  ;;  %v912_v2 = vadd.f32 %v1572_v19, %v688_v12  ;;  %v2883_v12 = vunpack.c.l.bf16 %v1801_v26 }
  0xe8   : > { %v943_v57 = vsub.f32 %v911_v7, %v879_v32  ;;  %v942_v61 = vsub.f32 %v910_v38, %v878_v9  ;;  %v1674_v32 = vld [vmem:[%s2314_s30 + $0x20] sm:$0xff]   ;;  %v913_v9 = vadd.f32 %v1573_v23, %v689_v36  ;;  %v2884_v22 = vunpack.c.h.bf16 %v1801_v26 }
  0xe9   : > { %v941_v24 = vsub.f32 %v909_v1, %v877_v15  ;;  %v914_v1 = vadd.f32 %v1576_v45, %v690_v21  ;;  %v2882_v15 = vunpack.c.l.bf16 %v2073_v35  ;;  %v1580_v48 = vunpack.c.l.bf16 %v1674_v32 }
  0xea   : > { %v975_v31 = vmul.f32 %v943_v57, %v943_v57  ;;  %v974_v13 = vmul.f32 %v942_v61, %v942_v61  ;;  %v692_v57 = vsub.f32 %v2883_v12, %v660_v58  ;;  %v1581_v45 = vunpack.c.h.bf16 %v1674_v32 }
  0xeb   : > { %v768_v50 = vpop.xlane.xlu2 %767  ;;  %v973_v42 = vmul.f32 %v941_v24, %v941_v24  ;;  %v765_v38 = vpop.xlane.xlu1 %764  ;;  %v693_v21 = vsub.f32 %v2884_v22, %v661_v25  ;;  %v2885_v23 = vunpack.c.h.bf16 %v1808_v29 }
  0xec   : > { %v850_v52 = vmul.f32 %v1821_v39, %v768_v50  ;;  %v762_v7 = vpop.xlane.xlu0 %761  ;;  %v1013_v8 = vsel %vm555_vm0, %v975_v31, 0.0  ;;  %v849_v10 = vmul.f32 %v1777_v14, %v765_v38  ;;  %v1010_v0 = vsel %vm555_vm0, %v974_v13, 0.0  ;;  %v1675_v38 = vld [vmem:[%s2314_s30 + $0x28] sm:$0xff]  }
  0xed   : > { %v848_v30 = vmul.f32 %v1760_v4, %v762_v7  ;;  %1014 = vadd.xlane.f32.xlu1 %v1013_v8  ;;  %v1007_v16 = vsel %vm555_vm0, %v973_v42, 0.0  ;;  %v2880_v39 = vunpack.c.l.bf16 %v2070_v40  ;;  %1011 = vadd.xlane.f32.xlu0 %v1010_v0  ;;  %v659_v14 = vmul.f32 %v1818_v37, %v2206_v27  ;;  %v2414_v0 = vld [vmem:[%s2314_s30 + $0x30] sm:$0xff]  }
  0xee   : > { %1008 = vadd.xlane.f32.xlu2 %v1007_v16  ;;  %v2881_v4 = vunpack.c.h.bf16 %v2073_v35  ;;  %v1577_v27 = vunpack.c.h.bf16 %v2359_v56  ;;  %v916_v13 = vadd.f32 %v1580_v48, %v692_v57  ;;  %v663_v42 = vmul.f32 %v1838_v47, %v2228_v60 }
  0xef   : > { %v882_v11 = vsub.f32 %v2880_v39, %v850_v52  ;;  %v880_v19 = vsub.f32 %v2882_v15, %v848_v30  ;;  %v691_v3 = vsub.f32 %v2885_v23, %v659_v14  ;;  %v917_v32 = vadd.f32 %v1581_v45, %v693_v21 }
  0xf0   : > { %v881_v20 = vsub.f32 %v2881_v4, %v849_v10  ;;  %v664_v60 = vmul.f32 %v1875_v18, %v2259_v28  ;;  %v1585_v39 = vunpack.c.h.bf16 %v1675_v38  ;;  %v2889_v28 = vunpack.c.h.bf16 %v1827_v41 }
  0xf1   : > { %v946_v46 = vsub.f32 %v914_v1, %v882_v11  ;;  %v944_v24 = vsub.f32 %v912_v2, %v880_v19  ;;  %v915_v30 = vadd.f32 %v1577_v27, %v691_v3  ;;  %v2888_v1 = vunpack.c.h.bf16 %v2070_v40  ;;  %v1677_v27 = vld [vmem:[%s2314_s30 + $0x38] sm:$0xff]  }
  0xf2   : > { %v945_v61 = vsub.f32 %v913_v9, %v881_v20  ;;  %v695_v11 = vsub.f32 %v2889_v28, %v663_v42  ;;  %v1588_v20 = vunpack.c.l.bf16 %v2414_v0  ;;  %v1584_v48 = vunpack.c.l.bf16 %v1675_v38 }
  0xf3   : > { %v978_v31 = vmul.f32 %v946_v46, %v946_v46  ;;  %v777_v35 = vpop.xlane.xlu2 %776  ;;  %v976_v50 = vmul.f32 %v944_v24, %v944_v24  ;;  %v774_v2 = vpop.xlane.xlu1 %773  ;;  %v666_v24 = vmul.f32 %v1867_v63, %v2252_v62  ;;  %v667_v62 = vmul.f32 %v1900_v43, %v2280_v54 }
  0xf4   : > { %v977_v36 = vmul.f32 %v945_v61, %v945_v61  ;;  %v853_v58 = vmul.f32 %v1846_v53, %v777_v35  ;;  %v771_v52 = vpop.xlane.xlu0 %770  ;;  %v852_v56 = vmul.f32 %v1814_v34, %v774_v2  ;;  %v2886_v53 = vunpack.c.h.bf16 %v2091_v44 }
  0xf5   : > { %v1022_v26 = vsel %vm555_vm0, %v978_v31, 0.0  ;;  %v851_v29 = vmul.f32 %v1818_v37, %v771_v52  ;;  %v1016_v8 = vsel %vm555_vm0, %v976_v50, 0.0  ;;  %v662_v34 = vmul.f32 %v1841_v49, %v2230_v51 }
  0xf6   : > { %v1019_v7 = vsel %vm555_vm0, %v977_v36, 0.0  ;;  %1023 = vadd.xlane.f32.xlu1 %v1022_v26  ;;  %v885_v10 = vsub.f32 %v2886_v53, %v853_v58  ;;  %1017 = vadd.xlane.f32.xlu2 %v1016_v8  ;;  %v2887_v37 = vunpack.c.l.bf16 %v2091_v44  ;;  %v2890_v51 = vunpack.c.l.bf16 %v1862_v59 }
  0xf7   : > { %1020 = vadd.xlane.f32.xlu0 %v1019_v7  ;;  %v883_v25 = vsub.f32 %v2888_v1, %v851_v29  ;;  %v2891_v44 = vunpack.c.l.bf16 %v1827_v41  ;;  %v919_v61 = vadd.f32 %v1585_v39, %v695_v11  ;;  %v2894_v58 = vunpack.c.l.bf16 %v2112_v5  ;;  %v2899_v1 = vld [vmem:[#allocation3_spill] sm:$0xff] }
  0xf8   : > { %v884_v16 = vsub.f32 %v2887_v37, %v852_v56  ;;  %v949_v9 = vsub.f32 %v917_v32, %v885_v10  ;;  %v696_v15 = vsub.f32 %v2890_v51, %v664_v60  ;;  %v1592_v52 = vunpack.c.l.bf16 %v1677_v27  ;;  %v2900_v51 = vld [vmem:[#allocation39_spill] sm:$0xff] }
  0xf9   : > { %v947_v4 = vsub.f32 %v915_v30, %v883_v25  ;;  %v694_v12 = vsub.f32 %v2891_v44, %v662_v34  ;;  %v2895_v26 = vunpack.c.l.bf16 %v1852_v55  ;;  %v1593_v7 = vunpack.c.h.bf16 %v1677_v27 }
  0xfa   : > { %v948_v14 = vsub.f32 %v916_v13, %v884_v16  ;;  %v981_v19 = vmul.f32 %v949_v9, %v949_v9  ;;  %v920_v36 = vadd.f32 %v1588_v20, %v696_v15  ;;  %v2896_v8 = vunpack.c.h.bf16 %v1852_v55  ;;  %v2898_v16 = vld [vmem:[#allocation35_spill] sm:$0xff]  ;;  %v1678_v9 = vld [vmem:[%s2314_s30 + $0x40] sm:$0xff]   ;;  %v2901_v15 = vld [vmem:[#allocation9_spill] sm:$0xff] }
  0xfb   : > { %v786_v40 = vpop.xlane.xlu2 %785  ;;  %v979_v46 = vmul.f32 %v947_v4, %v947_v4  ;;  %v783_v22 = vpop.xlane.xlu1 %782  ;;  %v918_v13 = vadd.f32 %v1584_v48, %v694_v12  ;;  %v698_v38 = vsub.f32 %v2895_v26, %v666_v24  ;;  %v2897_v53 = vunpack.c.h.bf16 %v1862_v59  ;;  %v2914_v26 = vld [vmem:[#allocation7_spill] sm:$0xff] }
  0xfc   : > { %v980_v57 = vmul.f32 %v948_v14, %v948_v14  ;;  %v856_v45 = vmul.f32 %v1875_v18, %v786_v40  ;;  %v780_v21 = vpop.xlane.xlu0 %779  ;;  %v1031_v31 = vsel %vm555_vm0, %v981_v19, 0.0  ;;  %v855_v23 = vmul.f32 %v1838_v47, %v783_v22  ;;  %v2904_v40 = vld [vmem:[#allocation36_spill] sm:$0xff] }
  0xfd   : > { %v854_v3 = vmul.f32 %v1841_v49, %v780_v21  ;;  %v1025_v35 = vsel %vm555_vm0, %v979_v46, 0.0  ;;  %v2892_v18 = vunpack.c.l.bf16 %v2109_v17  ;;  %v665_v47 = vmul.f32 %v1870_v6, %v2257_v33  ;;  %v2469_v46 = vld [vmem:[%s2314_s30 + $0x48] sm:$0xff]   ;;  %v2908_v21 = vld [vmem:[#allocation2_spill] sm:$0xff] }
  0xfe   : > { %v1028_v41 = vsel %vm555_vm0, %v980_v57, 0.0  ;;  %1032 = vadd.xlane.f32.xlu1 %v1031_v31  ;;  %1026 = vadd.xlane.f32.xlu2 %v1025_v35  ;;  %v2893_v49 = vunpack.c.h.bf16 %v2112_v5  ;;  %v699_v32 = vsub.f32 %v2896_v8, %v667_v62  ;;  %v1589_v33 = vunpack.c.h.bf16 %v2414_v0  ;;  %v2905_v57 = vld [vmem:[#allocation4_spill] sm:$0xff] }
  0xff   : > { %v888_v50 = vsub.f32 %v2892_v18, %v856_v45  ;;  %1029 = vadd.xlane.f32.xlu0 %v1028_v41  ;;  %v886_v2 = vsub.f32 %v2894_v58, %v854_v3  ;;  %v697_v10 = vsub.f32 %v2897_v53, %v665_v47  ;;  %v922_v37 = vadd.f32 %v1592_v52, %v698_v38  ;;  %v2913_v52 = vld [vmem:[#allocation37_spill] sm:$0xff]  ;;  %v1680_v8 = vld [vmem:[%s2314_s30 + $0x50] sm:$0xff]  }
 0x100   : > { %v887_v42 = vsub.f32 %v2893_v49, %v855_v23  ;;  %v669_v25 = vmul.f32 %v2899_v1, %v2898_v16  ;;  %v923_v20 = vadd.f32 %v1593_v7, %v699_v32  ;;  %v670_v19 = vmul.f32 %v2901_v15, %v2900_v51 }
 0x101   : > { %v952_v54 = vsub.f32 %v920_v36, %v888_v50  ;;  %v950_v29 = vsub.f32 %v918_v13, %v886_v2  ;;  %v921_v12 = vadd.f32 %v1589_v33, %v697_v10  ;;  %v2907_v24 = vunpack.c.h.bf16 %v2109_v17  ;;  %v2910_v36 = vld [vmem:[#allocation6_spill] sm:$0xff] }
 0x102   : > { %v951_v56 = vsub.f32 %v919_v61, %v887_v42  ;;  %v1597_v22 = vunpack.c.h.bf16 %v1678_v9  ;;  %v2909_v31 = vunpack.c.h.bf16 %v2908_v21  ;;  %v1600_v35 = vunpack.c.l.bf16 %v2469_v46 }
 0x103   : > { %v984_v60 = vmul.f32 %v952_v54, %v952_v54  ;;  %v795_v5 = vpop.xlane.xlu2 %794  ;;  %v982_v34 = vmul.f32 %v950_v29, %v950_v29  ;;  %v792_v28 = vpop.xlane.xlu1 %791  ;;  %v2911_v62 = vunpack.c.l.bf16 %v2910_v36  ;;  %v1596_v13 = vunpack.c.l.bf16 %v1678_v9 }
 0x104   : > { %v983_v30 = vmul.f32 %v951_v56, %v951_v56  ;;  %v859_v39 = vmul.f32 %v1900_v43, %v795_v5  ;;  %v789_v11 = vpop.xlane.xlu0 %788  ;;  %v858_v0 = vmul.f32 %v1867_v63, %v792_v28  ;;  %v2902_v43 = vld [vmem:[#allocation26_spill] sm:$0xff]  ;;  %v668_v63 = vmul.f32 %v2905_v57, %v2904_v40 }
 0x105   : > { %v1040_v55 = vsel %vm555_vm0, %v984_v60, 0.0  ;;  %v857_v59 = vmul.f32 %v1870_v6, %v789_v11  ;;  %v1034_v4 = vsel %vm555_vm0, %v982_v34, 0.0  ;;  %v2903_v48 = vunpack.c.h.bf16 %v2902_v43  ;;  %v2915_v5 = vld [vmem:[#allocation42_spill] sm:$0xff]  ;;  %v2920_v11 = vld [vmem:[#allocation8_spill] sm:$0xff] }
 0x106   : > { %v1037_v14 = vsel %vm555_vm0, %v983_v30, 0.0  ;;  %1041 = vadd.xlane.f32.xlu1 %v1040_v55  ;;  %1035 = vadd.xlane.f32.xlu2 %v1034_v4  ;;  %v2906_v6 = vunpack.c.l.bf16 %v2902_v43  ;;  %v701_v27 = vsub.f32 %v2909_v31, %v669_v25  ;;  %v702_v18 = vsub.f32 %v2911_v62, %v670_v19  ;;  %v2916_v30 = vld [vmem:[#allocation13_spill] sm:$0xff]  ;;  %v2919_v28 = vld [vmem:[#allocation38_spill] sm:$0xff]  ;;  %v2921_v55 = vld [vmem:[#allocation28_spill] sm:$0xff] }
 0x107   : > { %v891_v44 = vsub.f32 %v2903_v48, %v859_v39  ;;  %1038 = vadd.xlane.f32.xlu0 %v1037_v14  ;;  %v889_v45 = vsub.f32 %v2907_v24, %v857_v59  ;;  %v2912_v47 = vunpack.c.l.bf16 %v2908_v21  ;;  %v672_v38 = vmul.f32 %v2914_v26, %v2913_v52  ;;  %v2928_v31 = vld [vmem:[#allocation40_spill] sm:$0xff] }
 0x108   : > { %v890_v61 = vsub.f32 %v2906_v6, %v858_v0  ;;  %v925_v2 = vadd.f32 %v1597_v22, %v701_v27  ;;  %v926_v10 = vadd.f32 %v1600_v35, %v702_v18  ;;  %v673_v34 = vmul.f32 %v2916_v30, %v2915_v5  ;;  %v2929_v27 = vld [vmem:[#allocation11_spill] sm:$0xff]  ;;  %v1681_v18 = vld [vmem:[%s2314_s30 + $0x58] sm:$0xff]  }
 0x109   : > { %v955_v23 = vsub.f32 %v923_v20, %v891_v44  ;;  %v953_v41 = vsub.f32 %v921_v12, %v889_v45  ;;  %v700_v49 = vsub.f32 %v2912_v47, %v668_v63  ;;  %v2922_v9 = vunpack.c.h.bf16 %v2921_v55  ;;  %v2924_v20 = vld [vmem:[#allocation5_spill] sm:$0xff] }
 0x10a   : > { %v954_v3 = vsub.f32 %v922_v37, %v890_v61  ;;  %v2917_v37 = vld [vmem:[#allocation27_spill] sm:$0xff]  ;;  %v2923_v59 = vunpack.c.l.bf16 %v2921_v55  ;;  %v1604_v4 = vunpack.c.l.bf16 %v1680_v8  ;;  %v2925_v51 = vunpack.c.l.bf16 %v2924_v20 }
 0x10b   : > { %v987_v50 = vmul.f32 %v955_v23, %v955_v23  ;;  %v804_v17 = vpop.xlane.xlu2 %803  ;;  %v985_v58 = vmul.f32 %v953_v41, %v953_v41  ;;  %v801_v56 = vpop.xlane.xlu1 %800  ;;  %v2918_v16 = vunpack.c.l.bf16 %v2917_v37  ;;  %v924_v39 = vadd.f32 %v1596_v13, %v700_v49  ;;  %v2930_v49 = vld [vmem:[#allocation45_spill] sm:$0xff] }
 0x10c   : > { %v986_v42 = vmul.f32 %v954_v3, %v954_v3  ;;  %v862_v54 = vmul.f32 %v2901_v15, %v804_v17  ;;  %v798_v29 = vpop.xlane.xlu0 %797  ;;  %v861_v32 = vmul.f32 %v2899_v1, %v801_v56  ;;  %v671_v1 = vmul.f32 %v2920_v11, %v2919_v28  ;;  %v2931_v17 = vld [vmem:[#allocation18_spill] sm:$0xff]  ;;  %v2935_v56 = vld [vmem:[#allocation12_spill] sm:$0xff] }
 0x10d   : > { %v1049_v7 = vsel %vm555_vm0, %v987_v50, 0.0  ;;  %v860_v60 = vmul.f32 %v2905_v57, %v798_v29  ;;  %v1043_v53 = vsel %vm555_vm0, %v985_v58, 0.0  ;;  %v704_v15 = vsub.f32 %v2925_v51, %v672_v38  ;;  %v2932_v58 = vld [vmem:[#allocation29_spill] sm:$0xff]  ;;  %v2524_v29 = vld [vmem:[%s2314_s30 + $0x60] sm:$0xff]   ;;  %v2944_v51 = vld [vmem:[#allocation16_spill] sm:$0xff] }
 0x10e   : > { %v1046_v33 = vsel %vm555_vm0, %v986_v42, 0.0  ;;  %1050 = vadd.xlane.f32.xlu1 %v1049_v7  ;;  %v894_v25 = vsub.f32 %v2918_v16, %v862_v54  ;;  %1044 = vadd.xlane.f32.xlu2 %v1043_v53  ;;  %v893_v0 = vsub.f32 %v2922_v9, %v861_v32  ;;  %v1605_v44 = vunpack.c.h.bf16 %v1680_v8  ;;  %v2934_v54 = vld [vmem:[#allocation41_spill] sm:$0xff]  ;;  %v2938_v53 = vld [vmem:[#allocation10_spill] sm:$0xff] }
 0x10f   : > { %1047 = vadd.xlane.f32.xlu0 %v1046_v33  ;;  %v892_v14 = vsub.f32 %v2923_v59, %v860_v60  ;;  %v2926_v12 = vunpack.c.h.bf16 %v2924_v20  ;;  %v1601_v63 = vunpack.c.h.bf16 %v2469_v46  ;;  %v2927_v6 = vunpack.c.h.bf16 %v2910_v36  ;;  %v2943_v20 = vld [vmem:[#allocation43_spill] sm:$0xff] }
 0x110   : > { %v958_v19 = vsub.f32 %v926_v10, %v894_v25  ;;  %v957_v43 = vsub.f32 %v925_v2, %v893_v0  ;;  %v928_v21 = vadd.f32 %v1604_v4, %v704_v15  ;;  %v675_v23 = vmul.f32 %v2929_v27, %v2928_v31 }
 0x111   : > { %v956_v48 = vsub.f32 %v924_v39, %v892_v14  ;;  %v705_v40 = vsub.f32 %v2926_v12, %v673_v34  ;;  %v703_v61 = vsub.f32 %v2927_v6, %v671_v1  ;;  %v676_v42 = vmul.f32 %v2931_v17, %v2930_v49  ;;  %v2940_v39 = vld [vmem:[#allocation15_spill] sm:$0xff] }
 0x112   : > { %v990_v57 = vmul.f32 %v958_v19, %v958_v19  ;;  %v989_v45 = vmul.f32 %v957_v43, %v957_v43  ;;  %v2933_v2 = vunpack.c.h.bf16 %v2932_v58  ;;  %v2936_v7 = vunpack.c.l.bf16 %v2932_v58  ;;  %v1683_v12 = vld [vmem:[%s2314_s30 + $0x68] sm:$0xff]  }
 0x113   : > { %v813_v24 = vpop.xlane.xlu2 %812  ;;  %v988_v22 = vmul.f32 %v956_v48, %v956_v48  ;;  %v810_v41 = vpop.xlane.xlu1 %809  ;;  %v929_v47 = vadd.f32 %v1605_v44, %v705_v40  ;;  %v927_v38 = vadd.f32 %v1601_v63, %v703_v61  ;;  %v2937_v32 = vunpack.c.h.bf16 %v2917_v37 }
 0x114   : > { %v865_v3 = vmul.f32 %v2916_v30, %v813_v24  ;;  %v807_v35 = vpop.xlane.xlu0 %806  ;;  %v1058_v62 = vsel %vm555_vm0, %v990_v57, 0.0  ;;  %v864_v46 = vmul.f32 %v2914_v26, %v810_v41  ;;  %v1055_v50 = vsel %vm555_vm0, %v989_v45, 0.0  ;;  %v2945_v24 = vld [vmem:[#allocation48_spill] sm:$0xff]  ;;  %v2946_v45 = vld [vmem:[#allocation22_spill] sm:$0xff] }
 0x115   : > { %v863_v36 = vmul.f32 %v2920_v11, %v807_v35  ;;  %v1052_v13 = vsel %vm555_vm0, %v988_v22, 0.0  ;;  %v674_v26 = vmul.f32 %v2935_v56, %v2934_v54  ;;  %v1609_v33 = vunpack.c.h.bf16 %v1681_v18  ;;  %v2949_v41 = vld [vmem:[#allocation44_spill] sm:$0xff]  ;;  %v2950_v35 = vld [vmem:[#allocation17_spill] sm:$0xff] }
 0x116   : > { %1059 = vadd.xlane.f32.xlu1 %v1058_v62  ;;  %v897_v52 = vsub.f32 %v2933_v2, %v865_v3  ;;  %1053 = vadd.xlane.f32.xlu2 %v1052_v13  ;;  %v896_v8 = vsub.f32 %v2936_v7, %v864_v46  ;;  %v2939_v10 = vunpack.c.h.bf16 %v2938_v53  ;;  %v1612_v25 = vunpack.c.l.bf16 %v2524_v29  ;;  %v2951_v62 = vld [vmem:[#allocation31_spill] sm:$0xff] }
 0x117   : > { %1056 = vadd.xlane.f32.xlu0 %v1055_v50  ;;  %v895_v60 = vsub.f32 %v2937_v32, %v863_v36  ;;  %v2941_v28 = vunpack.c.l.bf16 %v2940_v39  ;;  %v1608_v55 = vunpack.c.l.bf16 %v1681_v18  ;;  %v2942_v9 = vunpack.c.l.bf16 %v2938_v53 }
 0x118   : > { %v707_v5 = vsub.f32 %v2939_v10, %v675_v23  ;;  %v961_v30 = vsub.f32 %v929_v47, %v897_v52  ;;  %v960_v34 = vsub.f32 %v928_v21, %v896_v8  ;;  %v678_v15 = vmul.f32 %v2944_v51, %v2943_v20  ;;  %v2947_v21 = vld [vmem:[#allocation30_spill] sm:$0xff] }
 0x119   : > { %v959_v16 = vsub.f32 %v927_v38, %v895_v60  ;;  %v708_v11 = vsub.f32 %v2941_v28, %v676_v42  ;;  %v706_v0 = vsub.f32 %v2942_v9, %v674_v26  ;;  %v679_v22 = vmul.f32 %v2946_v45, %v2945_v24  ;;  %v2954_v47 = vld [vmem:[#allocation14_spill] sm:$0xff] }
 0x11a   : > { %v993_v1 = vmul.f32 %v961_v30, %v961_v30  ;;  %v992_v59 = vmul.f32 %v960_v34, %v960_v34  ;;  %v931_v4 = vadd.f32 %v1609_v33, %v707_v5  ;;  %v2948_v31 = vunpack.c.l.bf16 %v2947_v21  ;;  %v2958_v10 = vld [vmem:[#allocation46_spill] sm:$0xff]  ;;  %v2959_v5 = vld [vmem:[#allocation20_spill] sm:$0xff] }
 0x11b   : > { %v822_v37 = vpop.xlane.xlu2 %821  ;;  %v991_v14 = vmul.f32 %v959_v16, %v959_v16  ;;  %v819_v43 = vpop.xlane.xlu1 %818  ;;  %v932_v61 = vadd.f32 %v1612_v25, %v708_v11  ;;  %v930_v3 = vadd.f32 %v1608_v55, %v706_v0  ;;  %v2952_v18 = vunpack.c.h.bf16 %v2951_v62  ;;  %v1684_v55 = vld [vmem:[%s2314_s30 + $0x70] sm:$0xff]   ;;  %v2960_v0 = vld [vmem:[#allocation50_spill] sm:$0xff] }
 0x11c   : > { %v868_v19 = vmul.f32 %v2931_v17, %v822_v37  ;;  %v816_v48 = vpop.xlane.xlu0 %815  ;;  %v1067_v44 = vsel %vm555_vm0, %v993_v1, 0.0  ;;  %v867_v40 = vmul.f32 %v2929_v27, %v819_v43  ;;  %v1064_v63 = vsel %vm555_vm0, %v992_v59, 0.0  ;;  %v2961_v37 = vld [vmem:[#allocation25_spill] sm:$0xff] }
 0x11d   : > { %v866_v57 = vmul.f32 %v2935_v56, %v816_v48  ;;  %v1061_v6 = vsel %vm555_vm0, %v991_v14, 0.0  ;;  %v677_v27 = vmul.f32 %v2950_v35, %v2949_v41  ;;  %v2953_v36 = vunpack.c.l.bf16 %v2951_v62  ;;  %v2962_v14 = vld [vmem:[#allocation32_spill] sm:$0xff]  ;;  %v1685_v48 = vld [vmem:[%s2314_s30 + $0x78] sm:$0xff]  }
 0x11e   : > { %1068 = vadd.xlane.f32.xlu1 %v1067_v44  ;;  %v900_v23 = vsub.f32 %v2948_v31, %v868_v19  ;;  %1062 = vadd.xlane.f32.xlu2 %v1061_v6  ;;  %v899_v46 = vsub.f32 %v2952_v18, %v867_v40  ;;  %v1616_v13 = vunpack.c.l.bf16 %v1683_v12  ;;  %v2955_v49 = vunpack.c.l.bf16 %v2954_v47  ;;  %v2964_v19 = vld [vmem:[#allocation47_spill] sm:$0xff] }
 0x11f   : > { %1065 = vadd.xlane.f32.xlu0 %v1064_v63  ;;  %v898_v50 = vsub.f32 %v2953_v36, %v866_v57  ;;  %v1617_v52 = vunpack.c.h.bf16 %v1683_v12  ;;  %v2956_v38 = vunpack.c.h.bf16 %v2954_v47  ;;  %v1613_v26 = vunpack.c.h.bf16 %v2524_v29 }
 0x120   : > { %v710_v17 = vsub.f32 %v2955_v49, %v678_v15  ;;  %v964_v42 = vsub.f32 %v932_v61, %v900_v23  ;;  %v963_v58 = vsub.f32 %v931_v4, %v899_v46  ;;  %v2957_v7 = vunpack.c.h.bf16 %v2940_v39 }
 0x121   : > { %v962_v2 = vsub.f32 %v930_v3, %v898_v50  ;;  %v711_v54 = vsub.f32 %v2956_v38, %v679_v22  ;;  %v681_v30 = vmul.f32 %v2959_v5, %v2958_v10  ;;  %v682_v59 = vmul.f32 %v2961_v37, %v2960_v0  ;;  %v2970_v3 = vld [vmem:[#allocation23_spill] sm:$0xff] }
 0x122   : > { %v996_v56 = vmul.f32 %v964_v42, %v964_v42  ;;  %v709_v8 = vsub.f32 %v2957_v7, %v677_v27  ;;  %v995_v60 = vmul.f32 %v963_v58, %v963_v58  ;;  %v934_v53 = vadd.f32 %v1616_v13, %v710_v17 }
 0x123   : > { %v831_v32 = vpop.xlane.xlu2 %830  ;;  %v994_v33 = vmul.f32 %v962_v2, %v962_v2  ;;  %v828_v16 = vpop.xlane.xlu1 %827  ;;  %v935_v9 = vadd.f32 %v1617_v52, %v711_v54  ;;  %v2963_v4 = vunpack.c.h.bf16 %v2962_v14  ;;  %v2966_v44 = vunpack.c.l.bf16 %v2962_v14 }
 0x124   : > { %v871_v34 = vmul.f32 %v2946_v45, %v831_v32  ;;  %v825_v25 = vpop.xlane.xlu0 %824  ;;  %v1076_v28 = vsel %vm555_vm0, %v996_v56, 0.0  ;;  %v870_v29 = vmul.f32 %v2944_v51, %v828_v16  ;;  %v1073_v11 = vsel %vm555_vm0, %v995_v60, 0.0  ;;  %v2965_v51 = vld [vmem:[#allocation21_spill] sm:$0xff]  ;;  %v2968_v45 = vld [vmem:[#allocation19_spill] sm:$0xff]  ;;  %v2976_v60 = vld [vmem:[#allocation24_spill] sm:$0xff] }
 0x125   : > { %v869_v39 = vmul.f32 %v2950_v35, %v825_v25  ;;  %v1070_v1 = vsel %vm555_vm0, %v994_v33, 0.0  ;;  %v933_v15 = vadd.f32 %v1613_v26, %v709_v8  ;;  %v680_v43 = vmul.f32 %v2965_v51, %v2964_v19  ;;  %v2973_v56 = vld [vmem:[#allocation33_spill] sm:$0xff] }
 0x126   : > { %1077 = vadd.xlane.f32.xlu1 %v1076_v28  ;;  %v903_v20 = vsub.f32 %v2963_v4, %v871_v34  ;;  %1071 = vadd.xlane.f32.xlu2 %v1070_v1  ;;  %v902_v12 = vsub.f32 %v2966_v44, %v870_v29  ;;  %v2967_v40 = vunpack.c.h.bf16 %v2947_v21  ;;  %v1621_v6 = vunpack.c.h.bf16 %v1684_v55  ;;  %v2975_v32 = vld [vmem:[#allocation49_spill] sm:$0xff] }
 0x127   : > { %1074 = vadd.xlane.f32.xlu0 %v1073_v11  ;;  %v2969_v22 = vunpack.c.h.bf16 %v2968_v45  ;;  %v1624_v23 = vunpack.c.l.bf16 %v1685_v48  ;;  %v2971_v41 = vunpack.c.l.bf16 %v2970_v3  ;;  %v1620_v62 = vunpack.c.l.bf16 %v1684_v55 }
 0x128   : > { %v901_v57 = vsub.f32 %v2967_v40, %v869_v39  ;;  %v967_v63 = vsub.f32 %v935_v9, %v903_v20  ;;  %v966_v61 = vsub.f32 %v934_v53, %v902_v12  ;;  %v2972_v18 = vunpack.c.l.bf16 %v2968_v45  ;;  %v2977_v53 = vld [vmem:[#allocation34_spill] sm:$0xff] }
 0x129   : > { %v713_v31 = vsub.f32 %v2969_v22, %v681_v30  ;;  %v714_v35 = vsub.f32 %v2971_v41, %v682_v59  ;;  %v2974_v26 = vunpack.c.l.bf16 %v2973_v56  ;;  %v683_v33 = vmul.f32 %v2976_v60, %v2975_v32 }
 0x12a   : > { %v965_v24 = vsub.f32 %v933_v15, %v901_v57  ;;  %v999_v27 = vmul.f32 %v967_v63, %v967_v63  ;;  %v712_v46 = vsub.f32 %v2972_v18, %v680_v43  ;;  %v998_v50 = vmul.f32 %v966_v61, %v966_v61 }
 0x12b   : > { %v840_v36 = vpop.xlane.xlu2 %839  ;;  %v837_v47 = vpop.xlane.xlu1 %836  ;;  %v937_v38 = vadd.f32 %v1621_v6, %v713_v31  ;;  %v938_v54 = vadd.f32 %v1624_v23, %v714_v35  ;;  %v2978_v10 = vunpack.c.h.bf16 %v2977_v53  ;;  %v2979_v30 = vunpack.c.l.bf16 %v2977_v53 }
 0x12c   : > { %v997_v21 = vmul.f32 %v965_v24, %v965_v24  ;;  %v874_v13 = vmul.f32 %v2961_v37, %v840_v36  ;;  %v834_v49 = vpop.xlane.xlu0 %833  ;;  %v1085_v17 = vsel %vm555_vm0, %v999_v27, 0.0  ;;  %v873_v42 = vmul.f32 %v2959_v5, %v837_v47 }
 0x12d   : > { %v872_v58 = vmul.f32 %v2965_v51, %v834_v49  ;;  %v1082_v2 = vsel %vm555_vm0, %v998_v50, 0.0  ;;  %v936_v8 = vadd.f32 %v1620_v62, %v712_v46  ;;  %v1625_v39 = vunpack.c.h.bf16 %v1685_v48 }
 0x12e   : > { %1086 = vadd.xlane.f32.xlu1 %v1085_v17  ;;  %v1079_v52 = vsel %vm555_vm0, %v997_v21, 0.0  ;;  %v906_v7 = vsub.f32 %v2974_v26, %v874_v13  ;;  %v905_v5 = vsub.f32 %v2978_v10, %v873_v42  ;;  %v2980_v11 = vunpack.c.h.bf16 %v2970_v3 }
 0x12f   : > { %1083 = vadd.xlane.f32.xlu0 %v1082_v2  ;;  %1080 = vadd.xlane.f32.xlu2 %v1079_v52  ;;  %v904_v34 = vsub.f32 %v2979_v30, %v872_v58  ;;  %v2981_v15 = vunpack.c.h.bf16 %v2973_v56 }
 0x130   : > { %v970_v16 = vsub.f32 %v938_v54, %v906_v7  ;;  %v969_v25 = vsub.f32 %v937_v38, %v905_v5  ;;  %v715_v1 = vsub.f32 %v2980_v11, %v683_v33 }
 0x131   : > { %v968_v28 = vsub.f32 %v936_v8, %v904_v34 }
 0x132   : > { %v1002_v29 = vmul.f32 %v970_v16, %v970_v16  ;;  %v1001_v55 = vmul.f32 %v969_v25, %v969_v25  ;;  %v939_v20 = vadd.f32 %v1625_v39, %v715_v1 }
 0x133   : > { %v1000_v9 = vmul.f32 %v968_v28, %v968_v28 }
 0x134   : > { %v843_v0 = vpop.xlane.xlu0 %842  ;;  %v1094_v37 = vsel %vm555_vm0, %v1002_v29, 0.0  ;;  %v1091_v14 = vsel %vm555_vm0, %v1001_v55, 0.0 }
 0x135   : > { %v875_v59 = vmul.f32 %v2976_v60, %v843_v0  ;;  %v1088_v4 = vsel %vm555_vm0, %v1000_v9, 0.0 }
 0x136   : > { %1095 = vadd.xlane.f32.xlu1 %v1094_v37 }
 0x137   : > { %1092 = vadd.xlane.f32.xlu0 %v1091_v14  ;;  %1089 = vadd.xlane.f32.xlu2 %v1088_v4  ;;  %v907_v19 = vsub.f32 %v2981_v15, %v875_v59 }
 0x139   : > { %v971_v51 = vsub.f32 %v939_v20, %v907_v19 }
 0x13b   : > { %v1003_v43 = vmul.f32 %v971_v51, %v971_v51 }
 0x13d   : > { %v1097_v48 = vsel %vm555_vm0, %v1003_v43, 0.0 }
 0x13f   : > { %1098 = vadd.xlane.f32.xlu2 %v1097_v48 }
 0x158   : > { %v1006_v44 = vpop.xlane.xlu1 %1005 }
 0x159   : > { %v1100_v12 = vsub.f32 0.0, %v1006_v44 }
 0x15b   : > { %vm1132_vm2 = vcmp.gt.f32.partialorder %v1100_v12, 0.0  ;;  %v1164_v40 = vmul.f32 0.2, %v1100_v12 }
 0x15d   : > { %v1196_v57 = vsel %vm1132_vm2, %v1100_v12, %v1164_v40 }
 0x15e   : > { %1229 = vst.msk [vmem:[%s2616_s8] sm:$0xff] %vm1228_vm1, %v1196_v57 }
 0x160   : > { %v1015_v63 = vpop.xlane.xlu1 %1014  ;;  %v1012_v24 = vpop.xlane.xlu0 %1011 }
 0x161   : > { %v1103_v6 = vsub.f32 0.0, %v1015_v63  ;;  %v1009_v61 = vpop.xlane.xlu2 %1008  ;;  %v1102_v22 = vsub.f32 0.0, %v1012_v24 }
 0x162   : > { %v1101_v45 = vsub.f32 0.0, %v1009_v61 }
 0x163   : > { %vm1135_vm3 = vcmp.gt.f32.partialorder %v1103_v6, 0.0  ;;  %v1167_v31 = vmul.f32 0.2, %v1103_v6  ;;  %vm1134_vm5 = vcmp.gt.f32.partialorder %v1102_v22, 0.0  ;;  %v1166_v3 = vmul.f32 0.2, %v1102_v22 }
 0x164   : > { %vm1133_vm4 = vcmp.gt.f32.partialorder %v1101_v45, 0.0  ;;  %v1165_v23 = vmul.f32 0.2, %v1101_v45 }
 0x165   : > { %v1199_v41 = vsel %vm1135_vm3, %v1103_v6, %v1167_v31  ;;  %v1198_v27 = vsel %vm1134_vm5, %v1102_v22, %v1166_v3 }
 0x166   : > { %1232 = vst.msk [vmem:[%s2616_s8 + $0x18] sm:$0xff] %vm1228_vm1, %v1199_v41  ;;  %v1197_v35 = vsel %vm1133_vm4, %v1101_v45, %v1165_v23 }
 0x167   : > { %1230 = vst.msk [vmem:[%s2616_s8 + $0x8] sm:$0xff] %vm1228_vm1, %v1197_v35 }
 0x168   : > { %1231 = vst.msk [vmem:[%s2616_s8 + $0x10] sm:$0xff] %vm1228_vm1, %v1198_v27 }
 0x169   : > { %v1024_v62 = vpop.xlane.xlu1 %1023  ;;  %v1018_v46 = vpop.xlane.xlu2 %1017 }
 0x16a   : > { %v1106_v18 = vsub.f32 0.0, %v1024_v62  ;;  %v1021_v36 = vpop.xlane.xlu0 %1020  ;;  %v1104_v50 = vsub.f32 0.0, %v1018_v46 }
 0x16b   : > { %v1105_v21 = vsub.f32 0.0, %v1021_v36 }
 0x16c   : > { %vm1138_vm6 = vcmp.gt.f32.partialorder %v1106_v18, 0.0  ;;  %v1170_v13 = vmul.f32 0.2, %v1106_v18  ;;  %vm1136_vm7 = vcmp.gt.f32.partialorder %v1104_v50, 0.0  ;;  %v1168_v47 = vmul.f32 0.2, %v1104_v50 }
 0x16d   : > { %vm1137_vm8 = vcmp.gt.f32.partialorder %v1105_v21, 0.0  ;;  %v1169_v49 = vmul.f32 0.2, %v1105_v21 }
 0x16e   : > { %v1202_v17 = vsel %vm1138_vm6, %v1106_v18, %v1170_v13  ;;  %v1200_v42 = vsel %vm1136_vm7, %v1104_v50, %v1168_v47 }
 0x16f   : > { %1235 = vst.msk [vmem:[%s2616_s8 + $0x30] sm:$0xff] %vm1228_vm1, %v1202_v17  ;;  %v1201_v58 = vsel %vm1137_vm8, %v1105_v21, %v1169_v49 }
 0x170   : > { %1233 = vst.msk [vmem:[%s2616_s8 + $0x20] sm:$0xff] %vm1228_vm1, %v1200_v42 }
 0x171   : > { %1234 = vst.msk [vmem:[%s2616_s8 + $0x28] sm:$0xff] %vm1228_vm1, %v1201_v58  ;;  %v1033_v2 = vpop.xlane.xlu1 %1032  ;;  %v1027_v38 = vpop.xlane.xlu2 %1026 }
 0x172   : > { %v1109_v52 = vsub.f32 0.0, %v1033_v2  ;;  %v1030_v54 = vpop.xlane.xlu0 %1029  ;;  %v1107_v56 = vsub.f32 0.0, %v1027_v38 }
 0x173   : > { %v1108_v26 = vsub.f32 0.0, %v1030_v54 }
 0x174   : > { %vm1141_vm9 = vcmp.gt.f32.partialorder %v1109_v52, 0.0  ;;  %v1173_v7 = vmul.f32 0.2, %v1109_v52  ;;  %vm1139_vm10 = vcmp.gt.f32.partialorder %v1107_v56, 0.0  ;;  %v1171_v8 = vmul.f32 0.2, %v1107_v56 }
 0x175   : > { %vm1140_vm11 = vcmp.gt.f32.partialorder %v1108_v26, 0.0  ;;  %v1172_v32 = vmul.f32 0.2, %v1108_v26 }
 0x176   : > { %v1205_v60 = vsel %vm1141_vm9, %v1109_v52, %v1173_v7  ;;  %v1203_v33 = vsel %vm1139_vm10, %v1107_v56, %v1171_v8 }
 0x177   : > { %1238 = vst.msk [vmem:[%s2616_s8 + $0x48] sm:$0xff] %vm1228_vm1, %v1205_v60  ;;  %v1204_v53 = vsel %vm1140_vm11, %v1108_v26, %v1172_v32 }
 0x178   : > { %1236 = vst.msk [vmem:[%s2616_s8 + $0x38] sm:$0xff] %vm1228_vm1, %v1203_v33 }
 0x179   : > { %1237 = vst.msk [vmem:[%s2616_s8 + $0x40] sm:$0xff] %vm1228_vm1, %v1204_v53  ;;  %v1042_v10 = vpop.xlane.xlu1 %1041  ;;  %v1036_v30 = vpop.xlane.xlu2 %1035 }
 0x17a   : > { %v1112_v5 = vsub.f32 0.0, %v1042_v10  ;;  %v1039_v34 = vpop.xlane.xlu0 %1038  ;;  %v1110_v16 = vsub.f32 0.0, %v1036_v30 }
 0x17b   : > { %v1111_v25 = vsub.f32 0.0, %v1039_v34 }
 0x17c   : > { %vm1144_vm12 = vcmp.gt.f32.partialorder %v1112_v5, 0.0  ;;  %v1176_v28 = vmul.f32 0.2, %v1112_v5  ;;  %vm1142_vm13 = vcmp.gt.f32.partialorder %v1110_v16, 0.0  ;;  %v1174_v29 = vmul.f32 0.2, %v1110_v16 }
 0x17d   : > { %vm1143_vm14 = vcmp.gt.f32.partialorder %v1111_v25, 0.0  ;;  %v1175_v39 = vmul.f32 0.2, %v1111_v25 }
 0x17e   : > { %v1208_v11 = vsel %vm1144_vm12, %v1112_v5, %v1176_v28  ;;  %v1206_v1 = vsel %vm1142_vm13, %v1110_v16, %v1174_v29 }
 0x17f   : > { %1241 = vst.msk [vmem:[%s2616_s8 + $0x60] sm:$0xff] %vm1228_vm1, %v1208_v11  ;;  %v1207_v55 = vsel %vm1143_vm14, %v1111_v25, %v1175_v39 }
 0x180   : > { %1239 = vst.msk [vmem:[%s2616_s8 + $0x50] sm:$0xff] %vm1228_vm1, %v1206_v1 }
 0x181   : > { %1240 = vst.msk [vmem:[%s2616_s8 + $0x58] sm:$0xff] %vm1228_vm1, %v1207_v55  ;;  %v1051_v9 = vpop.xlane.xlu1 %1050  ;;  %v1045_v37 = vpop.xlane.xlu2 %1044 }
 0x182   : > { %v1115_v0 = vsub.f32 0.0, %v1051_v9  ;;  %v1048_v59 = vpop.xlane.xlu0 %1047  ;;  %v1113_v14 = vsub.f32 0.0, %v1045_v37 }
 0x183   : > { %v1114_v4 = vsub.f32 0.0, %v1048_v59 }
 0x184   : > { %vm1147_vm15 = vcmp.gt.f32.partialorder %v1115_v0, 0.0  ;;  %v1179_v20 = vmul.f32 0.2, %v1115_v0  ;;  %vm1145_vm0 = vcmp.gt.f32.partialorder %v1113_v14, 0.0  ;;  %v1177_v15 = vmul.f32 0.2, %v1113_v14 }
 0x185   : > { %vm1146_vm2 = vcmp.gt.f32.partialorder %v1114_v4, 0.0  ;;  %v1178_v19 = vmul.f32 0.2, %v1114_v4 }
 0x186   : > { %v1211_v51 = vsel %vm1147_vm15, %v1115_v0, %v1179_v20  ;;  %v1209_v43 = vsel %vm1145_vm0, %v1113_v14, %v1177_v15 }
 0x187   : > { %1244 = vst.msk [vmem:[%s2616_s8 + $0x78] sm:$0xff] %vm1228_vm1, %v1211_v51  ;;  %v1210_v48 = vsel %vm1146_vm2, %v1114_v4, %v1178_v19 }
 0x188   : > { %1242 = vst.msk [vmem:[%s2616_s8 + $0x68] sm:$0xff] %vm1228_vm1, %v1209_v43 }
 0x189   : > { %1243 = vst.msk [vmem:[%s2616_s8 + $0x70] sm:$0xff] %vm1228_vm1, %v1210_v48  ;;  %v1060_v44 = vpop.xlane.xlu1 %1059  ;;  %v1054_v40 = vpop.xlane.xlu2 %1053 }
 0x18a   : > { %v1118_v12 = vsub.f32 0.0, %v1060_v44  ;;  %v1057_v57 = vpop.xlane.xlu0 %1056  ;;  %v1116_v63 = vsub.f32 0.0, %v1054_v40 }
 0x18b   : > { %v1117_v6 = vsub.f32 0.0, %v1057_v57 }
 0x18c   : > { %vm1150_vm3 = vcmp.gt.f32.partialorder %v1118_v12, 0.0  ;;  %v1182_v61 = vmul.f32 0.2, %v1118_v12  ;;  %vm1148_vm4 = vcmp.gt.f32.partialorder %v1116_v63, 0.0  ;;  %v1180_v24 = vmul.f32 0.2, %v1116_v63 }
 0x18d   : > { %vm1149_vm5 = vcmp.gt.f32.partialorder %v1117_v6, 0.0  ;;  %v1181_v45 = vmul.f32 0.2, %v1117_v6 }
 0x18e   : > { %v1214_v22 = vsel %vm1150_vm3, %v1118_v12, %v1182_v61  ;;  %v1212_v31 = vsel %vm1148_vm4, %v1116_v63, %v1180_v24 }
 0x18f   : > { %1247 = vst.msk [vmem:[%s2616_s8 + $0x90] sm:$0xff] %vm1228_vm1, %v1214_v22  ;;  %v1213_v23 = vsel %vm1149_vm5, %v1117_v6, %v1181_v45 }
 0x190   : > { %1245 = vst.msk [vmem:[%s2616_s8 + $0x80] sm:$0xff] %vm1228_vm1, %v1212_v31 }
 0x191   : > { %1246 = vst.msk [vmem:[%s2616_s8 + $0x88] sm:$0xff] %vm1228_vm1, %v1213_v23  ;;  %v1069_v3 = vpop.xlane.xlu1 %1068  ;;  %v1063_v35 = vpop.xlane.xlu2 %1062 }
 0x192   : > { %v1121_v41 = vsub.f32 0.0, %v1069_v3  ;;  %v1066_v27 = vpop.xlane.xlu0 %1065  ;;  %v1119_v62 = vsub.f32 0.0, %v1063_v35 }
 0x193   : > { %v1120_v18 = vsub.f32 0.0, %v1066_v27 }
 0x194   : > { %vm1153_vm6 = vcmp.gt.f32.partialorder %v1121_v41, 0.0  ;;  %v1185_v46 = vmul.f32 0.2, %v1121_v41  ;;  %vm1151_vm7 = vcmp.gt.f32.partialorder %v1119_v62, 0.0  ;;  %v1183_v36 = vmul.f32 0.2, %v1119_v62 }
 0x195   : > { %vm1152_vm8 = vcmp.gt.f32.partialorder %v1120_v18, 0.0  ;;  %v1184_v50 = vmul.f32 0.2, %v1120_v18 }
 0x196   : > { %v1217_v21 = vsel %vm1153_vm6, %v1121_v41, %v1185_v46  ;;  %v1215_v13 = vsel %vm1151_vm7, %v1119_v62, %v1183_v36 }
 0x197   : > { %1250 = vst.msk [vmem:[%s2616_s8 + $0xa8] sm:$0xff] %vm1228_vm1, %v1217_v21  ;;  %v1216_v47 = vsel %vm1152_vm8, %v1120_v18, %v1184_v50 }
 0x198   : > { %1248 = vst.msk [vmem:[%s2616_s8 + $0x98] sm:$0xff] %vm1228_vm1, %v1215_v13 }
 0x199   : > { %1249 = vst.msk [vmem:[%s2616_s8 + $0xa0] sm:$0xff] %vm1228_vm1, %v1216_v47  ;;  %v1078_v49 = vpop.xlane.xlu1 %1077  ;;  %v1072_v42 = vpop.xlane.xlu2 %1071 }
 0x19a   : > { %v1124_v17 = vsub.f32 0.0, %v1078_v49  ;;  %v1075_v58 = vpop.xlane.xlu0 %1074  ;;  %v1122_v2 = vsub.f32 0.0, %v1072_v42 }
 0x19b   : > { %v1123_v52 = vsub.f32 0.0, %v1075_v58 }
 0x19c   : > { %vm1156_vm9 = vcmp.gt.f32.partialorder %v1124_v17, 0.0  ;;  %v1188_v38 = vmul.f32 0.2, %v1124_v17  ;;  %vm1154_vm10 = vcmp.gt.f32.partialorder %v1122_v2, 0.0  ;;  %v1186_v54 = vmul.f32 0.2, %v1122_v2 }
 0x19d   : > { %vm1155_vm11 = vcmp.gt.f32.partialorder %v1123_v52, 0.0  ;;  %v1187_v56 = vmul.f32 0.2, %v1123_v52 }
 0x19e   : > { %v1220_v26 = vsel %vm1156_vm9, %v1124_v17, %v1188_v38  ;;  %v1218_v7 = vsel %vm1154_vm10, %v1122_v2, %v1186_v54 }
 0x19f   : > { %1253 = vst.msk [vmem:[%s2616_s8 + $0xc0] sm:$0xff] %vm1228_vm1, %v1220_v26  ;;  %v1219_v8 = vsel %vm1155_vm11, %v1123_v52, %v1187_v56 }
 0x1a0   : > { %1251 = vst.msk [vmem:[%s2616_s8 + $0xb0] sm:$0xff] %vm1228_vm1, %v1218_v7 }
 0x1a1   : > { %1252 = vst.msk [vmem:[%s2616_s8 + $0xb8] sm:$0xff] %vm1228_vm1, %v1219_v8  ;;  %v1087_v32 = vpop.xlane.xlu1 %1086 }
 0x1a2   : > { %v1127_v60 = vsub.f32 0.0, %v1087_v32  ;;  %v1081_v33 = vpop.xlane.xlu2 %1080  ;;  %v1084_v53 = vpop.xlane.xlu0 %1083 }
 0x1a3   : > { %v1125_v10 = vsub.f32 0.0, %v1081_v33  ;;  %v1126_v5 = vsub.f32 0.0, %v1084_v53 }
 0x1a4   : > { %vm1159_vm12 = vcmp.gt.f32.partialorder %v1127_v60, 0.0  ;;  %v1191_v30 = vmul.f32 0.2, %v1127_v60 }
 0x1a5   : > { %vm1157_vm13 = vcmp.gt.f32.partialorder %v1125_v10, 0.0  ;;  %v1189_v34 = vmul.f32 0.2, %v1125_v10  ;;  %vm1158_vm14 = vcmp.gt.f32.partialorder %v1126_v5, 0.0  ;;  %v1190_v16 = vmul.f32 0.2, %v1126_v5 }
 0x1a6   : > { %v1223_v25 = vsel %vm1159_vm12, %v1127_v60, %v1191_v30 }
 0x1a7   : > { %1256 = vst.msk [vmem:[%s2616_s8 + $0xd8] sm:$0xff] %vm1228_vm1, %v1223_v25  ;;  %v1221_v28 = vsel %vm1157_vm13, %v1125_v10, %v1189_v34  ;;  %v1222_v29 = vsel %vm1158_vm14, %v1126_v5, %v1190_v16 }
 0x1a8   : > { %1254 = vst.msk [vmem:[%s2616_s8 + $0xc8] sm:$0xff] %vm1228_vm1, %v1221_v28 }
 0x1a9   : > { %1255 = vst.msk [vmem:[%s2616_s8 + $0xd0] sm:$0xff] %vm1228_vm1, %v1222_v29  ;;  %v1096_v39 = vpop.xlane.xlu1 %1095 }
 0x1aa   : > { %v1130_v11 = vsub.f32 0.0, %v1096_v39  ;;  %v1090_v1 = vpop.xlane.xlu2 %1089  ;;  %v1093_v55 = vpop.xlane.xlu0 %1092 }
 0x1ab   : > { %v1128_v9 = vsub.f32 0.0, %v1090_v1  ;;  %v1129_v0 = vsub.f32 0.0, %v1093_v55 }
 0x1ac   : > { %vm1162_vm15 = vcmp.gt.f32.partialorder %v1130_v11, 0.0  ;;  %v1194_v37 = vmul.f32 0.2, %v1130_v11 }
 0x1ad   : > { %vm1160_vm0 = vcmp.gt.f32.partialorder %v1128_v9, 0.0  ;;  %v1192_v59 = vmul.f32 0.2, %v1128_v9  ;;  %vm1161_vm2 = vcmp.gt.f32.partialorder %v1129_v0, 0.0  ;;  %v1193_v14 = vmul.f32 0.2, %v1129_v0 }
 0x1ae   : > { %v1226_v4 = vsel %vm1162_vm15, %v1130_v11, %v1194_v37 }
 0x1af   : > { %1259 = vst.msk [vmem:[%s2616_s8 + $0xf0] sm:$0xff] %vm1228_vm1, %v1226_v4  ;;  %v1224_v20 = vsel %vm1160_vm0, %v1128_v9, %v1192_v59  ;;  %v1225_v15 = vsel %vm1161_vm2, %v1129_v0, %v1193_v14 }
 0x1b0   : > { %1257 = vst.msk [vmem:[%s2616_s8 + $0xe0] sm:$0xff] %vm1228_vm1, %v1224_v20 }
 0x1b1   : > { %1258 = vst.msk [vmem:[%s2616_s8 + $0xe8] sm:$0xff] %vm1228_vm1, %v1225_v15 }
 0x1b2   : > { %v1099_v19 = vpop.xlane.xlu2 %1098 }
 0x1b3   : > { %v1131_v51 = vsub.f32 0.0, %v1099_v19 }
 0x1b5   : > { %vm1163_vm3 = vcmp.gt.f32.partialorder %v1131_v51, 0.0  ;;  %v1195_v43 = vmul.f32 0.2, %v1131_v51 }
 0x1b7   : > { %v1227_v48 = vsel %vm1163_vm3, %v1131_v51, %v1195_v43 }
 0x1b8   : > { %1260 = vst.msk [vmem:[%s2616_s8 + $0xf8] sm:$0xff] %vm1228_vm1, %v1227_v48 }
 0x1b9 PF: > { %s14_s15 = sadd.s32 1, %s1700_s15  }
 0x1ba   : > { %p11_p4 = scmp.ge.s32.totalorder %s14_s15, 4  }
 0x1bc   :  { %13 = sbr.rel (!%p11_p4) target bundleno = 1 (0x1), region = 75 }

</bundles_post_ra>
